<compile_context>
chip_gen: v7x
topology: tpu7x:2x2x1
jax: 0.10.0
libtpu: 0.0.40
codegen_flags: <defaults>
</compile_context>

<pallas_src>
import jax
import jax.numpy as jnp
from jax.experimental import pallas as pl
from jax.experimental.pallas import tpu as pltpu


def _round_up(n, m):
    return (n + m - 1) // m * m


# ----------------------------------------------------------------------------
# Pallas kernel: fused embedding-gather + 6-layer MLP (Linear + ReLU) x 6
# ----------------------------------------------------------------------------
def _fused_mlp_kernel(t_sref,                                   # scalar prefetch (SMEM)
                      x_ref, emb_ref,
                      w1x_ref, w1e_ref, b1_ref,
                      w2_ref, b2_ref, w3_ref, b3_ref, w4_ref, b4_ref,
                      w5_ref, b5_ref, w6_ref, b6_ref,
                      o_ref,
                      emb_buf):
    tb = x_ref.shape[0]
    base = pl.program_id(0) * tb

    # In-kernel embedding gather: one dynamic leading-dim load per batch row
    # into a small VMEM scratch.  tb is small (8), so a static unrolled loop
    # is cheap and fully visible to the scheduler.
    for r in range(tb):
        emb_buf[pl.ds(r, 1), :] = emb_ref[t_sref[base + r]]     # (1, C)
    emb_t = emb_buf[...]                                        # (tb, C) f32

    # Layer 1: split-K matmul replaces torch.cat([xt, emb_t], dim=2).
    h = jnp.dot(x_ref[...].astype(jnp.bfloat16), w1x_ref[...],
                preferred_element_type=jnp.float32)
    h = h + jnp.dot(emb_t.astype(jnp.bfloat16), w1e_ref[...],
                    preferred_element_type=jnp.float32)
    h = jnp.maximum(h + b1_ref[...], 0.0)                       # f32 bias + ReLU

    def lin_relu(h, w_ref, b_ref):
        y = jnp.dot(h.astype(jnp.bfloat16), w_ref[...],
                    preferred_element_type=jnp.float32)
        return jnp.maximum(y + b_ref[...], 0.0)                 # keep f32 on VPU

    h = lin_relu(h, w2_ref, b2_ref)
    h = lin_relu(h, w3_ref, b3_ref)
    h = lin_relu(h, w4_ref, b4_ref)
    h = lin_relu(h, w5_ref, b5_ref)
    h = lin_relu(h, w6_ref, b6_ref)
    o_ref[...] = h.astype(o_ref.dtype)


def _fused_mlp(t_pad, x_pad, emb3, wk, bk, *, tb):
    """t_pad: (B_pad,) i32. x_pad: (B_pad, d_xt_pad) f32. emb3: (T, 1, C) f32.
    wk = [w1x, w1e, w2..w6] bf16 (padded). bk = [b1..b6] f32 (padded)."""
    b_pad, d_xt_pad = x_pad.shape
    c_emb = emb3.shape[2]
    out_pad = wk[-1].shape[1]
    grid = (b_pad // tb,)

    wb_args = [wk[0], wk[1], bk[0]]
    for w, b in zip(wk[2:], bk[1:]):
        wb_args += [w, b]

    def full_spec(a):
        nd = a.ndim
        # Constant block index -> array stays resident in VMEM across grid steps.
        return pl.BlockSpec(a.shape, lambda i, t, _nd=nd: (0,) * _nd)

    in_specs = ([pl.BlockSpec((tb, d_xt_pad), lambda i, t: (i, 0)),   # x tile
                 full_spec(emb3)]
                + [full_spec(a) for a in wb_args])
    out_specs = pl.BlockSpec((tb, out_pad), lambda i, t: (i, 0))

    flops = 2 * b_pad * sum(int(w.shape[0]) * int(w.shape[1]) for w in wk)
    bytes_accessed = (x_pad.size * x_pad.dtype.itemsize
                      + emb3.size * emb3.dtype.itemsize
                      + sum(a.size * a.dtype.itemsize for a in wb_args)
                      + b_pad * out_pad * 4)

    return pl.pallas_call(
        _fused_mlp_kernel,
        out_shape=jax.ShapeDtypeStruct((b_pad, out_pad), jnp.float32),
        grid_spec=pltpu.PrefetchScalarGridSpec(
            num_scalar_prefetch=1,
            grid=grid,
            in_specs=in_specs,
            out_specs=out_specs,
            scratch_shapes=[pltpu.VMEM((tb, c_emb), jnp.float32)]),
        compiler_params=pltpu.CompilerParams(
            dimension_semantics=("parallel",),
            vmem_limit_bytes=32 * 1024 * 1024),
        cost_estimate=pl.CostEstimate(
            flops=int(flops), transcendentals=0,
            bytes_accessed=int(bytes_accessed)),
    )(t_pad, x_pad, emb3, *wb_args)


# ----------------------------------------------------------------------------
# Parameters: PyTorch-like init (f32, unpadded) + one-time padded bf16 prep
# ----------------------------------------------------------------------------
def init_params(key, t_samples, image_shape):
    C, H = image_shape
    dims = [C * (H + 1), 400, 100, 50, 100, 400, 28 * 28]
    keys = jax.random.split(key, 1 + 2 * (len(dims) - 1))
    emb = jax.random.normal(keys[0], (t_samples, C), dtype=jnp.float32)
    weights, biases = [], []
    for i in range(len(dims) - 1):
        bound = 1.0 / (dims[i] ** 0.5)
        w = jax.random.uniform(keys[1 + 2 * i], (dims[i], dims[i + 1]),
                               jnp.float32, -bound, bound)
        b = jax.random.uniform(keys[2 + 2 * i], (1, dims[i + 1]),
                               jnp.float32, -bound, bound)
        weights.append(w)
        biases.append(b)
    return emb, weights, biases


def prepare_kernel_params(emb, weights, biases, image_shape):
    """Pad to lane/sublane-friendly shapes and cast weights to bf16 (once)."""
    C, H = image_shape
    d_xt = C * H
    d_xt_pad = _round_up(d_xt, 128)

    def pad2(a, rows, cols):
        return jnp.pad(a, ((0, rows - a.shape[0]), (0, cols - a.shape[1])))

    out_pads = [_round_up(w.shape[1], 128) for w in weights]

    w1 = weights[0]                                     # (C*(H+1), 400)
    wk = [pad2(w1[:d_xt], d_xt_pad, out_pads[0]).astype(jnp.bfloat16),  # W1_x
          pad2(w1[d_xt:], C, out_pads[0]).astype(jnp.bfloat16)]         # W1_emb
    bk = [pad2(biases[0], 1, out_pads[0])]
    in_pad = out_pads[0]
    for li in range(1, len(weights)):
        wk.append(pad2(weights[li], in_pad, out_pads[li]).astype(jnp.bfloat16))
        bk.append(pad2(biases[li], 1, out_pads[li]))
        in_pad = out_pads[li]

    emb3 = emb.reshape(emb.shape[0], 1, emb.shape[1])   # (T, 1, C) for ref[i] gather
    return emb3, wk, bk, d_xt_pad


# ----------------------------------------------------------------------------
# Forward pass
# ----------------------------------------------------------------------------
def make_forward(emb, weights, biases, image_shape, tb=8):
    # TODO(synk): for large batches raise tb to 128/256 so each MXU pass is M-full.
    emb3, wk, bk, d_xt_pad = prepare_kernel_params(emb, weights, biases, image_shape)
    C, H = image_shape
    d_xt = C * H
    out_dim = weights[-1].shape[1]                      # 28 * 28

    @jax.jit
    def forward(xt, t):
        B = xt.shape[0]
        b_pad = _round_up(B, tb)
        x = xt.reshape(B, d_xt)
        x = jnp.pad(x, ((0, b_pad - B), (0, d_xt_pad - d_xt)))
        t_pad = jnp.pad(t.astype(jnp.int32), (0, b_pad - B))
        out = _fused_mlp(t_pad, x, emb3, wk, bk, tb=tb)      # (b_pad, out_pad)
        return out[:B, :out_dim].reshape(B, 1, 28, 28)

    return forward


def ref_forward(xt, t, emb, weights, biases):
    """Pure-JAX reference applying the same bf16 rounding of weights/activations."""
    B = xt.shape[0]
    C = emb.shape[1]
    emb_t = emb[t].reshape(B, 1, 1, C)
    h = jnp.concatenate([xt, emb_t], axis=2).reshape(B, -1)
    for w, b in zip(weights, biases):
        wq = w.astype(jnp.bfloat16).astype(jnp.float32)
        hq = h.astype(jnp.bfloat16).astype(jnp.float32)
        h = jnp.maximum(hq @ wq + b, 0.0)
    return h.reshape(B, 1, 28, 28)


if __name__ == "__main__":
    key = jax.random.PRNGKey(0)
    k_param, k_x, k_t = jax.random.split(key, 3)

    B = 2
    t_samples = 10
    image_shape = (16, 16)          # (C, H): embedding dim 16, 16 image rows
    C, H = image_shape

    emb, weights, biases = init_params(k_param, t_samples, image_shape)
    forward = make_forward(emb, weights, biases, image_shape)

    xt = jax.random.normal(k_x, (B, 1, H, C), dtype=jnp.float32)
    t = jax.random.randint(k_t, (B,), 0, t_samples, dtype=jnp.int32)

    out = jax.block_until_ready(forward(xt, t))
    expected = jax.block_until_ready(ref_forward(xt, t, emb, weights, biases))

    assert out.shape == (B, 1, 28, 28), out.shape
    max_diff = float(jnp.max(jnp.abs(out - expected)))
    assert jnp.allclose(out, expected, atol=5e-3, rtol=5e-3), (
        f"mismatch vs JAX reference, max |diff| = {max_diff}")
    print("KERNEL_OK")
</pallas_src>

<mosaic_0001>
module attributes {stable_mosaic.version = 11 : i64} {
  func.func @_fused_mlp_kernel(%arg0: i32, %arg1: memref<8xi32, #tpu.memory_space<smem>>, %arg2: memref<8x256xf32, #tpu.memory_space<vmem>>, %arg3: memref<10x1x16xf32, #tpu.memory_space<vmem>>, %arg4: memref<256x512xbf16, #tpu.memory_space<vmem>>, %arg5: memref<16x512xbf16, #tpu.memory_space<vmem>>, %arg6: memref<1x512xf32, #tpu.memory_space<vmem>>, %arg7: memref<512x128xbf16, #tpu.memory_space<vmem>>, %arg8: memref<1x128xf32, #tpu.memory_space<vmem>>, %arg9: memref<128x128xbf16, #tpu.memory_space<vmem>>, %arg10: memref<1x128xf32, #tpu.memory_space<vmem>>, %arg11: memref<128x128xbf16, #tpu.memory_space<vmem>>, %arg12: memref<1x128xf32, #tpu.memory_space<vmem>>, %arg13: memref<128x512xbf16, #tpu.memory_space<vmem>>, %arg14: memref<1x512xf32, #tpu.memory_space<vmem>>, %arg15: memref<512x896xbf16, #tpu.memory_space<vmem>>, %arg16: memref<1x896xf32, #tpu.memory_space<vmem>>, %arg17: memref<8x896xf32, #tpu.memory_space<vmem>>, %arg18: memref<8x16xf32, #tpu.memory_space<vmem>>) attributes {dimension_semantics = [#tpu.dimension_semantics<parallel>], iteration_bounds = array<i64: 1>, scalar_prefetch = 1 : i64, scratch_operands = 1 : i64, tpu.core_type = #tpu.core_type<tc>, window_params = [{transform_indices = @transform_0, window_bounds = array<i64: 8, 256>}, {pipeline_mode = #tpu.pipeline_mode<synchronous>, transform_indices = @transform_1, window_bounds = array<i64: 10, 1, 16>}, {pipeline_mode = #tpu.pipeline_mode<synchronous>, transform_indices = @transform_2, window_bounds = array<i64: 256, 512>}, {pipeline_mode = #tpu.pipeline_mode<synchronous>, transform_indices = @transform_3, window_bounds = array<i64: 16, 512>}, {pipeline_mode = #tpu.pipeline_mode<synchronous>, transform_indices = @transform_4, window_bounds = array<i64: 1, 512>}, {pipeline_mode = #tpu.pipeline_mode<synchronous>, transform_indices = @transform_5, window_bounds = array<i64: 512, 128>}, {pipeline_mode = #tpu.pipeline_mode<synchronous>, transform_indices = @transform_6, window_bounds = array<i64: 1, 128>}, {pipeline_mode = #tpu.pipeline_mode<synchronous>, transform_indices = @transform_7, window_bounds = array<i64: 128, 128>}, {pipeline_mode = #tpu.pipeline_mode<synchronous>, transform_indices = @transform_8, window_bounds = array<i64: 1, 128>}, {pipeline_mode = #tpu.pipeline_mode<synchronous>, transform_indices = @transform_9, window_bounds = array<i64: 128, 128>}, {pipeline_mode = #tpu.pipeline_mode<synchronous>, transform_indices = @transform_10, window_bounds = array<i64: 1, 128>}, {pipeline_mode = #tpu.pipeline_mode<synchronous>, transform_indices = @transform_11, window_bounds = array<i64: 128, 512>}, {pipeline_mode = #tpu.pipeline_mode<synchronous>, transform_indices = @transform_12, window_bounds = array<i64: 1, 512>}, {pipeline_mode = #tpu.pipeline_mode<synchronous>, transform_indices = @transform_13, window_bounds = array<i64: 512, 896>}, {pipeline_mode = #tpu.pipeline_mode<synchronous>, transform_indices = @transform_14, window_bounds = array<i64: 1, 896>}, {transform_indices = @transform_15, window_bounds = array<i64: 8, 896>}]} {
    %c8_i32 = arith.constant 8 : i32
    %0 = arith.muli %arg0, %c8_i32 : i32
    %c0_i32 = arith.constant 0 : i32
    %1 = arith.addi %0, %c0_i32 : i32
    %2 = arith.index_cast %1 : i32 to index
    %3 = memref.load %arg1[%2] : memref<8xi32, #tpu.memory_space<smem>>
    %4 = arith.index_cast %3 : i32 to index
    %c0 = arith.constant 0 : index
    %c0_0 = arith.constant 0 : index
    %5 = vector.load %arg3[%4, %c0, %c0_0] : memref<10x1x16xf32, #tpu.memory_space<vmem>>, vector<1x1x16xf32>
    %6 = vector.shape_cast %5 : vector<1x1x16xf32> to vector<1x16xf32>
    %c0_1 = arith.constant 0 : index
    %c0_2 = arith.constant 0 : index
    %7 = vector.load %arg18[%c0_1, %c0_2] : memref<8x16xf32, #tpu.memory_space<vmem>>, vector<1x16xf32>
    tpu.vector_store %arg18[%c0_1, %c0_2], %6 {strides = array<i32>} : memref<8x16xf32, #tpu.memory_space<vmem>>, vector<1x16xf32>,
    %c1_i32 = arith.constant 1 : i32
    %8 = arith.addi %0, %c1_i32 : i32
    %9 = arith.index_cast %8 : i32 to index
    %10 = memref.load %arg1[%9] : memref<8xi32, #tpu.memory_space<smem>>
    %11 = arith.index_cast %10 : i32 to index
    %c0_3 = arith.constant 0 : index
    %c0_4 = arith.constant 0 : index
    %12 = vector.load %arg3[%11, %c0_3, %c0_4] : memref<10x1x16xf32, #tpu.memory_space<vmem>>, vector<1x1x16xf32>
    %13 = vector.shape_cast %12 : vector<1x1x16xf32> to vector<1x16xf32>
    %c1 = arith.constant 1 : index
    %c0_5 = arith.constant 0 : index
    %14 = vector.load %arg18[%c1, %c0_5] : memref<8x16xf32, #tpu.memory_space<vmem>>, vector<1x16xf32>
    tpu.vector_store %arg18[%c1, %c0_5], %13 {strides = array<i32>} : memref<8x16xf32, #tpu.memory_space<vmem>>, vector<1x16xf32>,
    %c2_i32 = arith.constant 2 : i32
    %15 = arith.addi %0, %c2_i32 : i32
    %16 = arith.index_cast %15 : i32 to index
    %17 = memref.load %arg1[%16] : memref<8xi32, #tpu.memory_space<smem>>
    %18 = arith.index_cast %17 : i32 to index
    %c0_6 = arith.constant 0 : index
    %c0_7 = arith.constant 0 : index
    %19 = vector.load %arg3[%18, %c0_6, %c0_7] : memref<10x1x16xf32, #tpu.memory_space<vmem>>, vector<1x1x16xf32>
    %20 = vector.shape_cast %19 : vector<1x1x16xf32> to vector<1x16xf32>
    %c2 = arith.constant 2 : index
    %c0_8 = arith.constant 0 : index
    %21 = vector.load %arg18[%c2, %c0_8] : memref<8x16xf32, #tpu.memory_space<vmem>>, vector<1x16xf32>
    tpu.vector_store %arg18[%c2, %c0_8], %20 {strides = array<i32>} : memref<8x16xf32, #tpu.memory_space<vmem>>, vector<1x16xf32>,
    %c3_i32 = arith.constant 3 : i32
    %22 = arith.addi %0, %c3_i32 : i32
    %23 = arith.index_cast %22 : i32 to index
    %24 = memref.load %arg1[%23] : memref<8xi32, #tpu.memory_space<smem>>
    %25 = arith.index_cast %24 : i32 to index
    %c0_9 = arith.constant 0 : index
    %c0_10 = arith.constant 0 : index
    %26 = vector.load %arg3[%25, %c0_9, %c0_10] : memref<10x1x16xf32, #tpu.memory_space<vmem>>, vector<1x1x16xf32>
    %27 = vector.shape_cast %26 : vector<1x1x16xf32> to vector<1x16xf32>
    %c3 = arith.constant 3 : index
    %c0_11 = arith.constant 0 : index
    %28 = vector.load %arg18[%c3, %c0_11] : memref<8x16xf32, #tpu.memory_space<vmem>>, vector<1x16xf32>
    tpu.vector_store %arg18[%c3, %c0_11], %27 {strides = array<i32>} : memref<8x16xf32, #tpu.memory_space<vmem>>, vector<1x16xf32>,
    %c4_i32 = arith.constant 4 : i32
    %29 = arith.addi %0, %c4_i32 : i32
    %30 = arith.index_cast %29 : i32 to index
    %31 = memref.load %arg1[%30] : memref<8xi32, #tpu.memory_space<smem>>
    %32 = arith.index_cast %31 : i32 to index
    %c0_12 = arith.constant 0 : index
    %c0_13 = arith.constant 0 : index
    %33 = vector.load %arg3[%32, %c0_12, %c0_13] : memref<10x1x16xf32, #tpu.memory_space<vmem>>, vector<1x1x16xf32>
    %34 = vector.shape_cast %33 : vector<1x1x16xf32> to vector<1x16xf32>
    %c4 = arith.constant 4 : index
    %c0_14 = arith.constant 0 : index
    %35 = vector.load %arg18[%c4, %c0_14] : memref<8x16xf32, #tpu.memory_space<vmem>>, vector<1x16xf32>
    tpu.vector_store %arg18[%c4, %c0_14], %34 {strides = array<i32>} : memref<8x16xf32, #tpu.memory_space<vmem>>, vector<1x16xf32>,
    %c5_i32 = arith.constant 5 : i32
    %36 = arith.addi %0, %c5_i32 : i32
    %37 = arith.index_cast %36 : i32 to index
    %38 = memref.load %arg1[%37] : memref<8xi32, #tpu.memory_space<smem>>
    %39 = arith.index_cast %38 : i32 to index
    %c0_15 = arith.constant 0 : index
    %c0_16 = arith.constant 0 : index
    %40 = vector.load %arg3[%39, %c0_15, %c0_16] : memref<10x1x16xf32, #tpu.memory_space<vmem>>, vector<1x1x16xf32>
    %41 = vector.shape_cast %40 : vector<1x1x16xf32> to vector<1x16xf32>
    %c5 = arith.constant 5 : index
    %c0_17 = arith.constant 0 : index
    %42 = vector.load %arg18[%c5, %c0_17] : memref<8x16xf32, #tpu.memory_space<vmem>>, vector<1x16xf32>
    tpu.vector_store %arg18[%c5, %c0_17], %41 {strides = array<i32>} : memref<8x16xf32, #tpu.memory_space<vmem>>, vector<1x16xf32>,
    %c6_i32 = arith.constant 6 : i32
    %43 = arith.addi %0, %c6_i32 : i32
    %44 = arith.index_cast %43 : i32 to index
    %45 = memref.load %arg1[%44] : memref<8xi32, #tpu.memory_space<smem>>
    %46 = arith.index_cast %45 : i32 to index
    %c0_18 = arith.constant 0 : index
    %c0_19 = arith.constant 0 : index
    %47 = vector.load %arg3[%46, %c0_18, %c0_19] : memref<10x1x16xf32, #tpu.memory_space<vmem>>, vector<1x1x16xf32>
    %48 = vector.shape_cast %47 : vector<1x1x16xf32> to vector<1x16xf32>
    %c6 = arith.constant 6 : index
    %c0_20 = arith.constant 0 : index
    %49 = vector.load %arg18[%c6, %c0_20] : memref<8x16xf32, #tpu.memory_space<vmem>>, vector<1x16xf32>
    tpu.vector_store %arg18[%c6, %c0_20], %48 {strides = array<i32>} : memref<8x16xf32, #tpu.memory_space<vmem>>, vector<1x16xf32>,
    %c7_i32 = arith.constant 7 : i32
    %50 = arith.addi %0, %c7_i32 : i32
    %51 = arith.index_cast %50 : i32 to index
    %52 = memref.load %arg1[%51] : memref<8xi32, #tpu.memory_space<smem>>
    %53 = arith.index_cast %52 : i32 to index
    %c0_21 = arith.constant 0 : index
    %c0_22 = arith.constant 0 : index
    %54 = vector.load %arg3[%53, %c0_21, %c0_22] : memref<10x1x16xf32, #tpu.memory_space<vmem>>, vector<1x1x16xf32>
    %55 = vector.shape_cast %54 : vector<1x1x16xf32> to vector<1x16xf32>
    %c7 = arith.constant 7 : index
    %c0_23 = arith.constant 0 : index
    %56 = vector.load %arg18[%c7, %c0_23] : memref<8x16xf32, #tpu.memory_space<vmem>>, vector<1x16xf32>
    tpu.vector_store %arg18[%c7, %c0_23], %55 {strides = array<i32>} : memref<8x16xf32, #tpu.memory_space<vmem>>, vector<1x16xf32>,
    %c0_24 = arith.constant 0 : index
    %c0_25 = arith.constant 0 : index
    %57 = vector.load %arg18[%c0_24, %c0_25] : memref<8x16xf32, #tpu.memory_space<vmem>>, vector<8x16xf32>
    %c0_26 = arith.constant 0 : index
    %c0_27 = arith.constant 0 : index
    %58 = vector.load %arg2[%c0_26, %c0_27] : memref<8x256xf32, #tpu.memory_space<vmem>>, vector<8x256xf32>
    %59 = arith.truncf %58 : vector<8x256xf32> to vector<8x256xbf16>
    %c0_28 = arith.constant 0 : index
    %c0_29 = arith.constant 0 : index
    %60 = vector.load %arg4[%c0_28, %c0_29] : memref<256x512xbf16, #tpu.memory_space<vmem>>, vector<256x512xbf16>
    %cst = arith.constant dense<0.000000e+00> : vector<8x512xf32>
    %61 = tpu.matmul %59, %60, %cst {dimension_numbers = #tpu.dot_dimension_numbers<[1], [0], [0], [1], [0, 0, 1, 1], [], []>} : vector<8x256xbf16>, vector<256x512xbf16>, vector<8x512xf32> -> vector<8x512xf32>
    %62 = arith.truncf %57 : vector<8x16xf32> to vector<8x16xbf16>
    %c0_30 = arith.constant 0 : index
    %c0_31 = arith.constant 0 : index
    %63 = vector.load %arg5[%c0_30, %c0_31] : memref<16x512xbf16, #tpu.memory_space<vmem>>, vector<16x512xbf16>
    %cst_32 = arith.constant dense<0.000000e+00> : vector<8x512xf32>
    %64 = tpu.matmul %62, %63, %cst_32 {dimension_numbers = #tpu.dot_dimension_numbers<[1], [0], [0], [1], [0, 0, 1, 1], [], []>} : vector<8x16xbf16>, vector<16x512xbf16>, vector<8x512xf32> -> vector<8x512xf32>
    %65 = arith.addf %61, %64 : vector<8x512xf32>
    %c0_33 = arith.constant 0 : index
    %c0_34 = arith.constant 0 : index
    %66 = vector.load %arg6[%c0_33, %c0_34] : memref<1x512xf32, #tpu.memory_space<vmem>>, vector<1x512xf32>
    %67 = vector.broadcast %66 : vector<1x512xf32> to vector<8x512xf32>
    %68 = arith.addf %65, %67 : vector<8x512xf32>
    %cst_35 = arith.constant 0.000000e+00 : f32
    %69 = vector.broadcast %cst_35 : f32 to vector<8x512xf32>
    %70 = arith.maximumf %68, %69 : vector<8x512xf32>
    %71 = arith.truncf %70 : vector<8x512xf32> to vector<8x512xbf16>
    %c0_36 = arith.constant 0 : index
    %c0_37 = arith.constant 0 : index
    %72 = vector.load %arg7[%c0_36, %c0_37] : memref<512x128xbf16, #tpu.memory_space<vmem>>, vector<512x128xbf16>
    %cst_38 = arith.constant dense<0.000000e+00> : vector<8x128xf32>
    %73 = tpu.matmul %71, %72, %cst_38 {dimension_numbers = #tpu.dot_dimension_numbers<[1], [0], [0], [1], [0, 0, 1, 1], [], []>} : vector<8x512xbf16>, vector<512x128xbf16>, vector<8x128xf32> -> vector<8x128xf32>
    %c0_39 = arith.constant 0 : index
    %c0_40 = arith.constant 0 : index
    %74 = vector.load %arg8[%c0_39, %c0_40] : memref<1x128xf32, #tpu.memory_space<vmem>>, vector<1x128xf32>
    %75 = vector.broadcast %74 : vector<1x128xf32> to vector<8x128xf32>
    %76 = arith.addf %73, %75 : vector<8x128xf32>
    %cst_41 = arith.constant 0.000000e+00 : f32
    %77 = vector.broadcast %cst_41 : f32 to vector<8x128xf32>
    %78 = arith.maximumf %76, %77 : vector<8x128xf32>
    %79 = arith.truncf %78 : vector<8x128xf32> to vector<8x128xbf16>
    %c0_42 = arith.constant 0 : index
    %c0_43 = arith.constant 0 : index
    %80 = vector.load %arg9[%c0_42, %c0_43] : memref<128x128xbf16, #tpu.memory_space<vmem>>, vector<128x128xbf16>
    %cst_44 = arith.constant dense<0.000000e+00> : vector<8x128xf32>
    %81 = tpu.matmul %79, %80, %cst_44 {dimension_numbers = #tpu.dot_dimension_numbers<[1], [0], [0], [1], [0, 0, 1, 1], [], []>} : vector<8x128xbf16>, vector<128x128xbf16>, vector<8x128xf32> -> vector<8x128xf32>
    %c0_45 = arith.constant 0 : index
    %c0_46 = arith.constant 0 : index
    %82 = vector.load %arg10[%c0_45, %c0_46] : memref<1x128xf32, #tpu.memory_space<vmem>>, vector<1x128xf32>
    %83 = vector.broadcast %82 : vector<1x128xf32> to vector<8x128xf32>
    %84 = arith.addf %81, %83 : vector<8x128xf32>
    %cst_47 = arith.constant 0.000000e+00 : f32
    %85 = vector.broadcast %cst_47 : f32 to vector<8x128xf32>
    %86 = arith.maximumf %84, %85 : vector<8x128xf32>
    %87 = arith.truncf %86 : vector<8x128xf32> to vector<8x128xbf16>
    %c0_48 = arith.constant 0 : index
    %c0_49 = arith.constant 0 : index
    %88 = vector.load %arg11[%c0_48, %c0_49] : memref<128x128xbf16, #tpu.memory_space<vmem>>, vector<128x128xbf16>
    %cst_50 = arith.constant dense<0.000000e+00> : vector<8x128xf32>
    %89 = tpu.matmul %87, %88, %cst_50 {dimension_numbers = #tpu.dot_dimension_numbers<[1], [0], [0], [1], [0, 0, 1, 1], [], []>} : vector<8x128xbf16>, vector<128x128xbf16>, vector<8x128xf32> -> vector<8x128xf32>
    %c0_51 = arith.constant 0 : index
    %c0_52 = arith.constant 0 : index
    %90 = vector.load %arg12[%c0_51, %c0_52] : memref<1x128xf32, #tpu.memory_space<vmem>>, vector<1x128xf32>
    %91 = vector.broadcast %90 : vector<1x128xf32> to vector<8x128xf32>
    %92 = arith.addf %89, %91 : vector<8x128xf32>
    %cst_53 = arith.constant 0.000000e+00 : f32
    %93 = vector.broadcast %cst_53 : f32 to vector<8x128xf32>
    %94 = arith.maximumf %92, %93 : vector<8x128xf32>
    %95 = arith.truncf %94 : vector<8x128xf32> to vector<8x128xbf16>
    %c0_54 = arith.constant 0 : index
    %c0_55 = arith.constant 0 : index
    %96 = vector.load %arg13[%c0_54, %c0_55] : memref<128x512xbf16, #tpu.memory_space<vmem>>, vector<128x512xbf16>
    %cst_56 = arith.constant dense<0.000000e+00> : vector<8x512xf32>
    %97 = tpu.matmul %95, %96, %cst_56 {dimension_numbers = #tpu.dot_dimension_numbers<[1], [0], [0], [1], [0, 0, 1, 1], [], []>} : vector<8x128xbf16>, vector<128x512xbf16>, vector<8x512xf32> -> vector<8x512xf32>
    %c0_57 = arith.constant 0 : index
    %c0_58 = arith.constant 0 : index
    %98 = vector.load %arg14[%c0_57, %c0_58] : memref<1x512xf32, #tpu.memory_space<vmem>>, vector<1x512xf32>
    %99 = vector.broadcast %98 : vector<1x512xf32> to vector<8x512xf32>
    %100 = arith.addf %97, %99 : vector<8x512xf32>
    %cst_59 = arith.constant 0.000000e+00 : f32
    %101 = vector.broadcast %cst_59 : f32 to vector<8x512xf32>
    %102 = arith.maximumf %100, %101 : vector<8x512xf32>
    %103 = arith.truncf %102 : vector<8x512xf32> to vector<8x512xbf16>
    %c0_60 = arith.constant 0 : index
    %c0_61 = arith.constant 0 : index
    %104 = vector.load %arg15[%c0_60, %c0_61] : memref<512x896xbf16, #tpu.memory_space<vmem>>, vector<512x896xbf16>
    %cst_62 = arith.constant dense<0.000000e+00> : vector<8x896xf32>
    %105 = tpu.matmul %103, %104, %cst_62 {dimension_numbers = #tpu.dot_dimension_numbers<[1], [0], [0], [1], [0, 0, 1, 1], [], []>} : vector<8x512xbf16>, vector<512x896xbf16>, vector<8x896xf32> -> vector<8x896xf32>
    %c0_63 = arith.constant 0 : index
    %c0_64 = arith.constant 0 : index
    %106 = vector.load %arg16[%c0_63, %c0_64] : memref<1x896xf32, #tpu.memory_space<vmem>>, vector<1x896xf32>
    %107 = vector.broadcast %106 : vector<1x896xf32> to vector<8x896xf32>
    %108 = arith.addf %105, %107 : vector<8x896xf32>
    %cst_65 = arith.constant 0.000000e+00 : f32
    %109 = vector.broadcast %cst_65 : f32 to vector<8x896xf32>
    %110 = arith.maximumf %108, %109 : vector<8x896xf32>
    %c0_66 = arith.constant 0 : index
    %c0_67 = arith.constant 0 : index
    %111 = vector.load %arg17[%c0_66, %c0_67] : memref<8x896xf32, #tpu.memory_space<vmem>>, vector<8x896xf32>
    tpu.vector_store %arg17[%c0_66, %c0_67], %110 {strides = array<i32>} : memref<8x896xf32, #tpu.memory_space<vmem>>, vector<8x896xf32>,
    return
  }
  func.func @transform_0(%arg0: i32, %arg1: memref<8xi32, #tpu.memory_space<smem>>) -> (i32, i32) {
    %c0_i32 = arith.constant 0 : i32
    %c0_i32_0 = arith.constant 0 : i32
    return %arg0, %c0_i32 : i32, i32
  }
  func.func @transform_1(%arg0: i32, %arg1: memref<8xi32, #tpu.memory_space<smem>>) -> (i32, i32, i32) {
    %c0_i32 = arith.constant 0 : i32
    %c0_i32_0 = arith.constant 0 : i32
    %c0_i32_1 = arith.constant 0 : i32
    %c0_i32_2 = arith.constant 0 : i32
    return %c0_i32, %c0_i32_0, %c0_i32_1 : i32, i32, i32
  }
  func.func @transform_2(%arg0: i32, %arg1: memref<8xi32, #tpu.memory_space<smem>>) -> (i32, i32) {
    %c0_i32 = arith.constant 0 : i32
    %c0_i32_0 = arith.constant 0 : i32
    %c0_i32_1 = arith.constant 0 : i32
    return %c0_i32, %c0_i32_0 : i32, i32
  }
  func.func @transform_3(%arg0: i32, %arg1: memref<8xi32, #tpu.memory_space<smem>>) -> (i32, i32) {
    %c0_i32 = arith.constant 0 : i32
    %c0_i32_0 = arith.constant 0 : i32
    %c0_i32_1 = arith.constant 0 : i32
    return %c0_i32, %c0_i32_0 : i32, i32
  }
  func.func @transform_4(%arg0: i32, %arg1: memref<8xi32, #tpu.memory_space<smem>>) -> (i32, i32) {
    %c0_i32 = arith.constant 0 : i32
    %c0_i32_0 = arith.constant 0 : i32
    %c0_i32_1 = arith.constant 0 : i32
    return %c0_i32, %c0_i32_0 : i32, i32
  }
  func.func @transform_5(%arg0: i32, %arg1: memref<8xi32, #tpu.memory_space<smem>>) -> (i32, i32) {
    %c0_i32 = arith.constant 0 : i32
    %c0_i32_0 = arith.constant 0 : i32
    %c0_i32_1 = arith.constant 0 : i32
    return %c0_i32, %c0_i32_0 : i32, i32
  }
  func.func @transform_6(%arg0: i32, %arg1: memref<8xi32, #tpu.memory_space<smem>>) -> (i32, i32) {
    %c0_i32 = arith.constant 0 : i32
    %c0_i32_0 = arith.constant 0 : i32
    %c0_i32_1 = arith.constant 0 : i32
    return %c0_i32, %c0_i32_0 : i32, i32
  }
  func.func @transform_7(%arg0: i32, %arg1: memref<8xi32, #tpu.memory_space<smem>>) -> (i32, i32) {
    %c0_i32 = arith.constant 0 : i32
    %c0_i32_0 = arith.constant 0 : i32
    %c0_i32_1 = arith.constant 0 : i32
    return %c0_i32, %c0_i32_0 : i32, i32
  }
  func.func @transform_8(%arg0: i32, %arg1: memref<8xi32, #tpu.memory_space<smem>>) -> (i32, i32) {
    %c0_i32 = arith.constant 0 : i32
    %c0_i32_0 = arith.constant 0 : i32
    %c0_i32_1 = arith.constant 0 : i32
    return %c0_i32, %c0_i32_0 : i32, i32
  }
  func.func @transform_9(%arg0: i32, %arg1: memref<8xi32, #tpu.memory_space<smem>>) -> (i32, i32) {
    %c0_i32 = arith.constant 0 : i32
    %c0_i32_0 = arith.constant 0 : i32
    %c0_i32_1 = arith.constant 0 : i32
    return %c0_i32, %c0_i32_0 : i32, i32
  }
  func.func @transform_10(%arg0: i32, %arg1: memref<8xi32, #tpu.memory_space<smem>>) -> (i32, i32) {
    %c0_i32 = arith.constant 0 : i32
    %c0_i32_0 = arith.constant 0 : i32
    %c0_i32_1 = arith.constant 0 : i32
    return %c0_i32, %c0_i32_0 : i32, i32
  }
  func.func @transform_11(%arg0: i32, %arg1: memref<8xi32, #tpu.memory_space<smem>>) -> (i32, i32) {
    %c0_i32 = arith.constant 0 : i32
    %c0_i32_0 = arith.constant 0 : i32
    %c0_i32_1 = arith.constant 0 : i32
    return %c0_i32, %c0_i32_0 : i32, i32
  }
  func.func @transform_12(%arg0: i32, %arg1: memref<8xi32, #tpu.memory_space<smem>>) -> (i32, i32) {
    %c0_i32 = arith.constant 0 : i32
    %c0_i32_0 = arith.constant 0 : i32
    %c0_i32_1 = arith.constant 0 : i32
    return %c0_i32, %c0_i32_0 : i32, i32
  }
  func.func @transform_13(%arg0: i32, %arg1: memref<8xi32, #tpu.memory_space<smem>>) -> (i32, i32) {
    %c0_i32 = arith.constant 0 : i32
    %c0_i32_0 = arith.constant 0 : i32
    %c0_i32_1 = arith.constant 0 : i32
    return %c0_i32, %c0_i32_0 : i32, i32
  }
  func.func @transform_14(%arg0: i32, %arg1: memref<8xi32, #tpu.memory_space<smem>>) -> (i32, i32) {
    %c0_i32 = arith.constant 0 : i32
    %c0_i32_0 = arith.constant 0 : i32
    %c0_i32_1 = arith.constant 0 : i32
    return %c0_i32, %c0_i32_0 : i32, i32
  }
  func.func @transform_15(%arg0: i32, %arg1: memref<8xi32, #tpu.memory_space<smem>>) -> (i32, i32) {
    %c0_i32 = arith.constant 0 : i32
    %c0_i32_0 = arith.constant 0 : i32
    return %arg0, %c0_i32 : i32, i32
  }
}

</mosaic_0001>

<bundles_post_ra>
// kernel: forward.1
= control target key start
LH: loop header
LB: loop body
LE: loop exit
PB: predicated region body
PF: predicated region fallthrough
CT: control target
= control target key end

     0   :  { %s5840_s0 = inlined_call_operand.vmem [shape: s32[8], index: 0, kind: input, shape index: {}]   ;;  %s5841_s1 = inlined_call_operand.vmem [shape: f32[8,256], index: 1, kind: input, shape index: {}]   ;;  %s5842_s2 = inlined_call_operand.vmem [shape: f32[10,1,16], index: 2, kind: input, shape index: {}]   ;;  %s5843_s3 = inlined_call_operand.vmem [shape: bf16[256,512], index: 3, kind: input, shape index: {}]   ;;  %s5844_s4 = inlined_call_operand.vmem [shape: bf16[16,512], index: 4, kind: input, shape index: {}]   ;;  %s5845_s5 = inlined_call_operand.vmem [shape: f32[1,512], index: 5, kind: input, shape index: {}]   ;;  %s5846_s6 = inlined_call_operand.vmem [shape: bf16[512,128], index: 6, kind: input, shape index: {}]   ;;  %s5847_s7 = inlined_call_operand.vmem [shape: f32[1,128], index: 7, kind: input, shape index: {}]   ;;  %s5848_s8 = inlined_call_operand.vmem [shape: bf16[128,128], index: 8, kind: input, shape index: {}]   ;;  %s5849_s9 = inlined_call_operand.vmem [shape: f32[1,128], index: 9, kind: input, shape index: {}]   ;;  %s5850_s10 = inlined_call_operand.vmem [shape: bf16[128,128], index: 10, kind: input, shape index: {}]   ;;  %s5851_s11 = inlined_call_operand.vmem [shape: f32[1,128], index: 11, kind: input, shape index: {}]   ;;  %s5852_s12 = inlined_call_operand.vmem [shape: bf16[128,512], index: 12, kind: input, shape index: {}]   ;;  %s5853_s13 = inlined_call_operand.vmem [shape: f32[1,512], index: 13, kind: input, shape index: {}]   ;;  %s5854_s14 = inlined_call_operand.vmem [shape: bf16[512,896], index: 14, kind: input, shape index: {}]   ;;  %s5855_s15 = inlined_call_operand.vmem [shape: f32[1,896], index: 15, kind: input, shape index: {}]   ;;  %s5856_s16 = inlined_call_operand.vmem [shape: f32[8,896], index: 16, kind: output, shape index: {}]  }
   0x1   :  { %5858 = sst [smem:[#allocation6_spill]] %s5840_s0 }
   0x2   :  { %5859 = sst [smem:[#allocation7_spill]] %s5849_s9  ;;  %s5863_s23 = sld [smem:[#allocation6_spill]] }
   0x3   :  { %5860 = sst [smem:[#allocation8_spill]] %s5853_s13 }
   0x4   :  { %5861 = sst [smem:[#allocation9_spill]] %s5855_s15 }
   0x5   :  { %5862 = sst [smem:[#allocation10_spill]] %s5856_s16 }
   0x8   :  { %s21_s9 = sshll.u32 %s5863_s23, 4  ;;  %s22_s9 = int_to_ptr.vmem [resolvable:$true] %s21_s9 }
   0x9   :  { %s4457_s24 = scalar_lea.vmem %s22_s9, 16  ;;  %p4462_p1 = scmp.lt.s32.totalorder %s22_s9, %s22_s9 }
   0xa   :  { %p4458_p0 = scmp.ne.s32.totalorder %s22_s9, %s4457_s24  ;;  %p4463_p2 = scmp.lt.s32.totalorder %s4457_s24, %s4457_s24 }
   0xc   :  { %p4464_p3 = por %p4463_p2, %p4462_p1 }
   0xe   :  { %p4465_p4 = pnand %p4464_p3, %p4458_p0 }
  0x10   :  { %4468 = shalt.err (!%p4465_p4)  }
  0x11   :  { %s4471_s25 = smov [#allocation4]  }
  0x12   :  { %24 = dma.vmem_to_smem %s22_s9, 16, %s4471_s25, [#allocation3] }
  0x13   :  { %4469 = dma.done.wait [#allocation3], 16 }
  0x14   :  { %4470 = vsyncadd [#allocation3], 4294967280 }
  0x15   :  { %26 = sfence }
  0x16   :  { %v3939_v0 = vld [vmem:[%s5844_s4 + $0x4] ss:$16 sps:$4 sm:$0xff]   ;;  %v3941_v1 = vld [vmem:[%s5844_s4 + $0xc] ss:$16 sps:$4 sm:$0xff]   ;;  %v4472_v2 = vmov 0   ;;  %s59_s30 = sld [smem:[#allocation4]] }
  0x17   :  { %229 = vmatprep.mubr.bf16.mxu0 %v4472_v2  ;;  %270 = vmatprep.mubr.bf16.mxu1 %v4472_v2  ;;  %v3943_v3 = vld [vmem:[%s5844_s4] ss:$16 sps:$4 sm:$0xff]   ;;  %v3944_v4 = vld [vmem:[%s5844_s4 + $0x8] ss:$16 sps:$4 sm:$0xff]   ;;  %v3947_v5 = vld [vmem:[%s5843_s3 + $0x4] ss:$16 sps:$4 sm:$0xff]  }
  0x18   :  { %197 = vmatprep.subr.bf16.mxu0 %v3939_v0  ;;  %238 = vmatprep.subr.bf16.mxu1 %v3941_v1  ;;  %vm62_vm0 = vcmask 122880   ;;  %s3387_s21 = sld [smem:[#allocation4 + $0x1]]  ;;  %v3950_v6 = vld [vmem:[%s5843_s3 + $0xc] ss:$16 sps:$4 sm:$0xff]   ;;  %s3388_s24 = sld [smem:[#allocation4 + $0x2]]  ;;  %vm193_vm1 = vcmask 130048  }
  0x19   :  { %198 = vmatpush1.bf16.msra.mxu0 %v3943_v3  ;;  %239 = vmatpush1.bf16.msra.mxu1 %v3944_v4  ;;  %s3389_s25 = sld [smem:[#allocation4 + $0x3]]  ;;  %s3390_s26 = sld [smem:[#allocation4 + $0x4]]  ;;  %v3945_v15 = vld [vmem:[%s5843_s3] ss:$16 sps:$4 sm:$0xff]   ;;  %v3948_v16 = vld [vmem:[%s5843_s3 + $0x8] ss:$16 sps:$4 sm:$0xff]  }
  0x1a   :  { %599 = vmatprep.subr.bf16.mxu0 %v3947_v5  ;;  %s3391_s27 = sld [smem:[#allocation4 + $0x5]]  ;;  %640 = vmatprep.subr.bf16.mxu1 %v3950_v6  ;;  %s3392_s0 = sld [smem:[#allocation4 + $0x6]]  ;;  %v3953_v18 = vld [vmem:[%s5843_s3 + $0x24] ss:$16 sps:$4 sm:$0xff]   ;;  %v3956_v20 = vld [vmem:[%s5843_s3 + $0x2c] ss:$16 sps:$4 sm:$0xff]  }
  0x1b   :  { %s3393_s9 = sld [smem:[#allocation4 + $0x7]]  ;;  %v3951_v21 = vld [vmem:[%s5843_s3 + $0x20] ss:$16 sps:$4 sm:$0xff]   ;;  %v3954_v22 = vld [vmem:[%s5843_s3 + $0x28] ss:$16 sps:$4 sm:$0xff]   ;;  %vm4474_vm2 = vmmov 0  }
  0x1c   :  { %s60_s29 = scalar_lea.vmem %s5842_s2, %s59_s30  ;;  %v3959_v23 = vld [vmem:[%s5843_s3 + $0x44] ss:$16 sps:$4 sm:$0xff]   ;;  %v3962_v24 = vld [vmem:[%s5843_s3 + $0x4c] ss:$16 sps:$4 sm:$0xff]   ;;  %v3957_v25 = vld [vmem:[%s5843_s3 + $0x40] ss:$16 sps:$4 sm:$0xff]  }
  0x1d   :  { %v61_v7 = vld [vmem:[%s60_s29] sm:$0x1]  ;;  %v3960_v26 = vld [vmem:[%s5843_s3 + $0x48] ss:$16 sps:$4 sm:$0xff]   ;;  %v3965_v27 = vld [vmem:[%s5843_s3 + $0x64] ss:$16 sps:$4 sm:$0xff]  }
  0x1e   :  { %63 = vst.msk [vmem:[#allocation2] sm:$0x1] %vm62_vm0, %v61_v7  ;;  %s66_s19 = scalar_lea.vmem %s5842_s2, %s3387_s21  ;;  %s71_s23 = scalar_lea.vmem %s5842_s2, %s3388_s24  ;;  %v3968_v28 = vld [vmem:[%s5843_s3 + $0x6c] ss:$16 sps:$4 sm:$0xff]   ;;  %v3963_v29 = vld [vmem:[%s5843_s3 + $0x60] ss:$16 sps:$4 sm:$0xff]  }
  0x1f   :  { %v67_v8 = vld [vmem:[%s66_s19] sm:$0x1]  ;;  %s76_s13 = scalar_lea.vmem %s5842_s2, %s3389_s25  ;;  %s81_s28 = scalar_lea.vmem %s5842_s2, %s3390_s26  ;;  %v3966_v30 = vld [vmem:[%s5843_s3 + $0x68] ss:$16 sps:$4 sm:$0xff]   ;;  %v3971_v31 = vld [vmem:[%s5843_s3 + $0x84] ss:$16 sps:$4 sm:$0xff]  }
  0x20   :  { %68 = vst.msk [vmem:[#allocation2 + $0x1] sm:$0x1] %vm62_vm0, %v67_v8  ;;  %v72_v9 = vld [vmem:[%s71_s23] sm:$0x1]  ;;  %s86_s21 = scalar_lea.vmem %s5842_s2, %s3391_s27  ;;  %s91_s24 = scalar_lea.vmem %s5842_s2, %s3392_s0  ;;  %v3974_v32 = vld [vmem:[%s5843_s3 + $0x8c] ss:$16 sps:$4 sm:$0xff]  }
  0x21   :  { %v77_v10 = vld [vmem:[%s76_s13] sm:$0x1]  ;;  %73 = vst.msk [vmem:[#allocation2 + $0x2] sm:$0x1] %vm62_vm0, %v72_v9  ;;  %s96_s26 = scalar_lea.vmem %s5842_s2, %s3393_s9  ;;  %v3972_v34 = vld [vmem:[%s5843_s3 + $0x88] ss:$16 sps:$4 sm:$0xff]  }
  0x22   :  { %78 = vst.msk [vmem:[#allocation2 + $0x3] sm:$0x1] %vm62_vm0, %v77_v10  ;;  %v82_v11 = vld [vmem:[%s81_s28] sm:$0x1]  ;;  %v3977_v35 = vld [vmem:[%s5843_s3 + $0xa4] ss:$16 sps:$4 sm:$0xff]  }
  0x23   :  { %v87_v12 = vld [vmem:[%s86_s21] sm:$0x1]  ;;  %83 = vst.msk [vmem:[#allocation2 + $0x4] sm:$0x1] %vm62_vm0, %v82_v11  ;;  %v3980_v36 = vld [vmem:[%s5843_s3 + $0xac] ss:$16 sps:$4 sm:$0xff]  }
  0x24   :  { %88 = vst.msk [vmem:[#allocation2 + $0x5] sm:$0x1] %vm62_vm0, %v87_v12  ;;  %v92_v13 = vld [vmem:[%s91_s24] sm:$0x1]  ;;  %v3978_v38 = vld [vmem:[%s5843_s3 + $0xa8] ss:$16 sps:$4 sm:$0xff]  }
  0x25   :  { %93 = vst.msk [vmem:[#allocation2 + $0x6] sm:$0x1] %vm62_vm0, %v92_v13  ;;  %v97_v14 = vld [vmem:[%s96_s26] sm:$0x1]  ;;  %v3983_v39 = vld [vmem:[%s5843_s3 + $0xc4] ss:$16 sps:$4 sm:$0xff]  }
  0x26   :  { %98 = vst.msk [vmem:[#allocation2 + $0x7] sm:$0x1] %vm62_vm0, %v97_v14  ;;  %v3969_v33 = vld [vmem:[%s5843_s3 + $0x80] ss:$16 sps:$4 sm:$0xff]   ;;  %v3986_v40 = vld [vmem:[%s5843_s3 + $0xcc] ss:$16 sps:$4 sm:$0xff]  }
  0x27   :  { %v3975_v37 = vld [vmem:[%s5843_s3 + $0xa0] ss:$16 sps:$4 sm:$0xff]   ;;  %v3984_v42 = vld [vmem:[%s5843_s3 + $0xc8] ss:$16 sps:$4 sm:$0xff]   ;;  %v3989_v43 = vld [vmem:[%s5843_s3 + $0xe4] ss:$16 sps:$4 sm:$0xff]  }
  0x28   :  { %v3981_v41 = vld [vmem:[%s5843_s3 + $0xc0] ss:$16 sps:$4 sm:$0xff]   ;;  %v3992_v44 = vld [vmem:[%s5843_s3 + $0xec] ss:$16 sps:$4 sm:$0xff]   ;;  %v3990_v46 = vld [vmem:[%s5843_s3 + $0xe8] ss:$16 sps:$4 sm:$0xff]  }
  0x29   :  { %v3987_v45 = vld [vmem:[%s5843_s3 + $0xe0] ss:$16 sps:$4 sm:$0xff]   ;;  %v101_v47 = vld [vmem:[%s5841_s1 + $0x8] sm:$0xff]  ;;  %v3995_v48 = vld [vmem:[%s5843_s3 + $0x104] ss:$16 sps:$4 sm:$0xff]   ;;  %s5864_s2 = sld [smem:[#allocation7_spill]] }
  0x2a   :  { %v3998_v49 = vld [vmem:[%s5843_s3 + $0x10c] ss:$16 sps:$4 sm:$0xff]   ;;  %v103_v50 = vpack.c.bf16 %v101_v47, %v101_v47  ;;  %v3993_v51 = vld [vmem:[%s5843_s3 + $0x100] ss:$16 sps:$4 sm:$0xff]   ;;  %v3996_v52 = vld [vmem:[%s5843_s3 + $0x108] ss:$16 sps:$4 sm:$0xff]  }
  0x2b   :  { %v4001_v53 = vld [vmem:[%s5843_s3 + $0x124] ss:$16 sps:$4 sm:$0xff]   ;;  %v4004_v54 = vld [vmem:[%s5843_s3 + $0x12c] ss:$16 sps:$4 sm:$0xff]   ;;  %v3999_v55 = vld [vmem:[%s5843_s3 + $0x120] ss:$16 sps:$4 sm:$0xff]  }
  0x2c   :  { %v4002_v56 = vld [vmem:[%s5843_s3 + $0x128] ss:$16 sps:$4 sm:$0xff]   ;;  %v4007_v57 = vld [vmem:[%s5843_s3 + $0x144] ss:$16 sps:$4 sm:$0xff]   ;;  %v4010_v58 = vld [vmem:[%s5843_s3 + $0x14c] ss:$16 sps:$4 sm:$0xff]  }
  0x2d   :  { %v99_v17 = vld [vmem:[#allocation2] sm:$0xff]  ;;  %v4008_v60 = vld [vmem:[%s5843_s3 + $0x148] ss:$16 sps:$4 sm:$0xff]   ;;  %v4016_v62 = vld [vmem:[%s5843_s3 + $0x16c] ss:$16 sps:$4 sm:$0xff]   ;;  %s5865_s18 = sld [smem:[#allocation8_spill]] }
  0x2e   :  { %v168_v19 = vpack.c.bf16 %v99_v17, %v99_v17  ;;  %v4005_v59 = vld [vmem:[%s5843_s3 + $0x140] ss:$16 sps:$4 sm:$0xff]   ;;  %v4013_v61 = vld [vmem:[%s5843_s3 + $0x164] ss:$16 sps:$4 sm:$0xff]   ;;  %v4014_v0 = vld [vmem:[%s5843_s3 + $0x168] ss:$16 sps:$4 sm:$0xff]  }
  0x2f   :  { %v4011_v63 = vld [vmem:[%s5843_s3 + $0x160] ss:$16 sps:$4 sm:$0xff]   ;;  %v4019_v1 = vld [vmem:[%s5843_s3 + $0x184] ss:$16 sps:$4 sm:$0xff]   ;;  %v4022_v3 = vld [vmem:[%s5843_s3 + $0x18c] ss:$16 sps:$4 sm:$0xff]  }
  0x30   :  { %3398 = vmatmul.mubr.msk.bf16.vlgmr.msra.gmra.mrb[0].mxu0 %vm193_vm1, %v168_v19  ;;  %3399 = vmatmul.mubr.msk.bf16.vlgmr.msra.gmra.mrb[0].mxu1 %vm193_vm1, %v168_v19  ;;  %v4017_v4 = vld [vmem:[%s5843_s3 + $0x180] ss:$16 sps:$4 sm:$0xff]   ;;  %v4020_v5 = vld [vmem:[%s5843_s3 + $0x188] ss:$16 sps:$4 sm:$0xff]   ;;  %v4025_v6 = vld [vmem:[%s5843_s3 + $0x1a4] ss:$16 sps:$4 sm:$0xff]  }
  0x31   :  { %600 = vmatpush1.bf16.msra.mxu0 %v3945_v15  ;;  %641 = vmatpush1.bf16.msra.mxu1 %v3948_v16  ;;  %v4028_v7 = vld [vmem:[%s5843_s3 + $0x1ac] ss:$16 sps:$4 sm:$0xff]   ;;  %v4023_v8 = vld [vmem:[%s5843_s3 + $0x1a0] ss:$16 sps:$4 sm:$0xff]   ;;  %v4026_v9 = vld [vmem:[%s5843_s3 + $0x1a8] ss:$16 sps:$4 sm:$0xff]  }
  0x32   :  { %601 = vmatprep.subr.bf16.mxu0 %v3953_v18  ;;  %642 = vmatprep.subr.bf16.mxu1 %v3956_v20  ;;  %v4031_v10 = vld [vmem:[%s5843_s3 + $0x1c4] ss:$16 sps:$4 sm:$0xff]   ;;  %v4034_v11 = vld [vmem:[%s5843_s3 + $0x1cc] ss:$16 sps:$4 sm:$0xff]   ;;  %v4029_v12 = vld [vmem:[%s5843_s3 + $0x1c0] ss:$16 sps:$4 sm:$0xff]  }
  0x33   :  { %631 = vmatprep.mubr.bf16.mxu0 %v103_v50  ;;  %672 = vmatprep.mubr.bf16.mxu1 %v103_v50  ;;  %v4032_v13 = vld [vmem:[%s5843_s3 + $0x1c8] ss:$16 sps:$4 sm:$0xff]   ;;  %v4037_v14 = vld [vmem:[%s5843_s3 + $0x1e4] ss:$16 sps:$4 sm:$0xff]   ;;  %v4040_v15 = vld [vmem:[%s5843_s3 + $0x1ec] ss:$16 sps:$4 sm:$0xff]  }
  0x34   :  { %v4035_v16 = vld [vmem:[%s5843_s3 + $0x1e0] ss:$16 sps:$4 sm:$0xff]   ;;  %v4038_v17 = vld [vmem:[%s5843_s3 + $0x1e8] ss:$16 sps:$4 sm:$0xff]   ;;  %s5866_s21 = sld [smem:[#allocation9_spill]]  ;;  %s5867_s15 = sld [smem:[#allocation10_spill]] }
  0x35   :  { %602 = vmatpush1.bf16.msra.mxu0 %v3951_v21  ;;  %643 = vmatpush1.bf16.msra.mxu1 %v3954_v22  ;;  %v100_v18 = vld [vmem:[%s5841_s1] sm:$0xff]  ;;  %v4043_v22 = vld [vmem:[%s5846_s6 + $0x48] sm:$0xff]  }
  0x36   :  { %603 = vmatprep.subr.bf16.mxu0 %v3959_v23  ;;  %644 = vmatprep.subr.bf16.mxu1 %v3962_v24  ;;  %v102_v19 = vpack.c.bf16 %v100_v18, %v100_v18  ;;  %v4041_v20 = vld [vmem:[%s5846_s6 + $0x40] sm:$0xff]   ;;  %v4044_v23 = vld [vmem:[%s5846_s6 + $0x8] sm:$0xff]   ;;  %v4045_v24 = vld [vmem:[%s5846_s6 + $0x50] sm:$0xff]  }
  0x37   :  { %v4042_v21 = vld [vmem:[%s5846_s6] sm:$0xff]   ;;  %v4064_v18 = vld [vmem:[%s5846_s6 + $0x98] sm:$0xff]  }
  0x39   :  { %604 = vmatpush1.bf16.msra.mxu0 %v3957_v25  ;;  %645 = vmatpush1.bf16.msra.mxu1 %v3960_v26  ;;  %v4046_v25 = vld [vmem:[%s5846_s6 + $0x10] sm:$0xff]   ;;  %v4047_v26 = vld [vmem:[%s5846_s6 + $0x58] sm:$0xff]  }
  0x3a   :  { %605 = vmatprep.subr.bf16.mxu0 %v3965_v27  ;;  %646 = vmatprep.subr.bf16.mxu1 %v3968_v28  ;;  %v4048_v27 = vld [vmem:[%s5846_s6 + $0x18] sm:$0xff]   ;;  %v4049_v28 = vld [vmem:[%s5846_s6 + $0x60] sm:$0xff]  }
  0x3d   :  { %606 = vmatpush1.bf16.msra.mxu0 %v3963_v29  ;;  %647 = vmatpush1.bf16.msra.mxu1 %v3966_v30  ;;  %v4050_v29 = vld [vmem:[%s5846_s6 + $0x20] sm:$0xff]   ;;  %v4051_v30 = vld [vmem:[%s5846_s6 + $0x68] sm:$0xff]  }
  0x3e   :  { %607 = vmatprep.subr.bf16.mxu0 %v3971_v31  ;;  %648 = vmatprep.subr.bf16.mxu1 %v3974_v32  ;;  %v4052_v31 = vld [vmem:[%s5846_s6 + $0x28] sm:$0xff]   ;;  %v4053_v32 = vld [vmem:[%s5846_s6 + $0x70] sm:$0xff]  }
  0x41   :  { %608 = vmatpush1.bf16.msra.mxu0 %v3969_v33  ;;  %649 = vmatpush1.bf16.msra.mxu1 %v3972_v34  ;;  %v4054_v33 = vld [vmem:[%s5846_s6 + $0x30] sm:$0xff]   ;;  %v4055_v34 = vld [vmem:[%s5846_s6 + $0x78] sm:$0xff]  }
  0x42   :  { %609 = vmatprep.subr.bf16.mxu0 %v3977_v35  ;;  %650 = vmatprep.subr.bf16.mxu1 %v3980_v36  ;;  %v4056_v35 = vld [vmem:[%s5846_s6 + $0x38] sm:$0xff]   ;;  %v4057_v36 = vld [vmem:[%s5846_s6 + $0xc0] sm:$0xff]  }
  0x45   :  { %610 = vmatpush1.bf16.msra.mxu0 %v3975_v37  ;;  %651 = vmatpush1.bf16.msra.mxu1 %v3978_v38 }
  0x46   :  { %611 = vmatprep.subr.bf16.mxu0 %v3983_v39  ;;  %652 = vmatprep.subr.bf16.mxu1 %v3986_v40 }
  0x49   :  { %612 = vmatpush1.bf16.msra.mxu0 %v3981_v41  ;;  %653 = vmatpush1.bf16.msra.mxu1 %v3984_v42 }
  0x4a   :  { %613 = vmatprep.subr.bf16.mxu0 %v3989_v43  ;;  %654 = vmatprep.subr.bf16.mxu1 %v3992_v44 }
  0x4d   :  { %614 = vmatpush1.bf16.msra.mxu0 %v3987_v45  ;;  %655 = vmatpush1.bf16.msra.mxu1 %v3990_v46  ;;  %v683_v45 = vlaneseq }
  0x4e   :  { %615 = vmatprep.subr.bf16.mxu0 %v3995_v48  ;;  %656 = vmatprep.subr.bf16.mxu1 %v3998_v49  ;;  %v681_v48 = vld [vmem:[%s5845_s5] sm:$0xf] }
  0x4f   :  { %v4858_v46 = vshrl.u32 %v683_v45, 7  ;;  %v4085_v45 = vld [vmem:[%s5850_s10 + $0x20] sm:$0xff]  }
  0x51   :  { %616 = vmatpush1.bf16.msra.mxu0 %v3993_v51  ;;  %657 = vmatpush1.bf16.msra.mxu1 %v3996_v52  ;;  %v4861_v47 = vsub.s32 0, %v4858_v46  ;;  %v4867_v49 = vsub.s32 1, %v4858_v46  ;;  %v4870_v50 = vsub.s32 3, %v4858_v46 }
  0x52   :  { %617 = vmatprep.subr.bf16.mxu0 %v4001_v53  ;;  %658 = vmatprep.subr.bf16.mxu1 %v4004_v54 }
  0x53   :  { %v686_v51 = vrot.slane %v681_v48, %v4861_v47  ;;  %v690_v54 = vrot.slane %v681_v48, %v4867_v49 }
  0x55   :  { %618 = vmatpush1.bf16.msra.mxu0 %v3999_v55  ;;  %659 = vmatpush1.bf16.msra.mxu1 %v4002_v56  ;;  %v698_v55 = vrot.slane %v681_v48, %v4870_v50 }
  0x56   :  { %619 = vmatprep.subr.bf16.mxu0 %v4007_v57  ;;  %660 = vmatprep.subr.bf16.mxu1 %v4010_v58 }
  0x59   :  { %620 = vmatpush1.bf16.msra.mxu0 %v4005_v59  ;;  %661 = vmatpush1.bf16.msra.mxu1 %v4008_v60 }
  0x5a   :  { %621 = vmatprep.subr.bf16.mxu0 %v4013_v61  ;;  %662 = vmatprep.subr.bf16.mxu1 %v4016_v62 }
  0x5d   :  { %622 = vmatpush1.bf16.msra.mxu0 %v4011_v63  ;;  %663 = vmatpush1.bf16.msra.mxu1 %v4014_v0 }
  0x5e   :  { %623 = vmatprep.subr.bf16.mxu0 %v4019_v1  ;;  %664 = vmatprep.subr.bf16.mxu1 %v4022_v3 }
  0x61   :  { %624 = vmatpush1.bf16.msra.mxu0 %v4017_v4  ;;  %665 = vmatpush1.bf16.msra.mxu1 %v4020_v5 }
  0x62   :  { %625 = vmatprep.subr.bf16.mxu0 %v4025_v6  ;;  %666 = vmatprep.subr.bf16.mxu1 %v4028_v7 }
  0x65   :  { %626 = vmatpush1.bf16.msra.mxu0 %v4023_v8  ;;  %667 = vmatpush1.bf16.msra.mxu1 %v4026_v9 }
  0x66   :  { %627 = vmatprep.subr.bf16.mxu0 %v4031_v10  ;;  %668 = vmatprep.subr.bf16.mxu1 %v4034_v11  ;;  %v4058_v10 = vld [vmem:[%s5846_s6 + $0x80] sm:$0xff]  }
  0x69   :  { %628 = vmatpush1.bf16.msra.mxu0 %v4029_v12  ;;  %669 = vmatpush1.bf16.msra.mxu1 %v4032_v13  ;;  %v4059_v12 = vld [vmem:[%s5846_s6 + $0xc8] sm:$0xff]  }
  0x6a   :  { %629 = vmatprep.subr.bf16.mxu0 %v4037_v14  ;;  %670 = vmatprep.subr.bf16.mxu1 %v4040_v15  ;;  %v4060_v14 = vld [vmem:[%s5846_s6 + $0x88] sm:$0xff]   ;;  %v4061_v15 = vld [vmem:[%s5846_s6 + $0xd0] sm:$0xff]  }
  0x6d   :  { %630 = vmatpush1.bf16.msra.mxu0 %v4035_v16  ;;  %671 = vmatpush1.bf16.msra.mxu1 %v4038_v17  ;;  %v4062_v16 = vld [vmem:[%s5846_s6 + $0x90] sm:$0xff]   ;;  %v4063_v17 = vld [vmem:[%s5846_s6 + $0xd8] sm:$0xff]  }
  0x6e   :  { %3771 = vmatprep.subr.bf16.mxu1 %v4041_v20  ;;  %v4066_v20 = vld [vmem:[%s5846_s6 + $0xa0] sm:$0xff]  }
  0x70   :  { %632 = vmatmul.mubr.bf16.vlgmr.msra.gmra.mrb[4].mxu0 %v102_v19  ;;  %673 = vmatmul.mubr.bf16.vlgmr.msra.gmra.mrb[4].mxu1 %v102_v19  ;;  %v4065_v19 = vld [vmem:[%s5846_s6 + $0xe0] sm:$0xff]  }
  0x71   :  { %3772 = vmatpush3.bf16.msra.mxu1 %v4042_v21  ;;  %v4903_v21 = vsub.s32 2, %v4858_v46 }
  0x72   :  { %3773 = vmatprep.subr.bf16.mxu1 %v4043_v22  ;;  %v4067_v22 = vld [vmem:[%s5846_s6 + $0xe8] sm:$0xff]  }
  0x75   :  { %3774 = vmatpush3.bf16.msra.mxu1 %v4044_v23  ;;  %v4068_v23 = vld [vmem:[%s5846_s6 + $0xa8] sm:$0xff]  }
  0x76   :  { %3775 = vmatprep.subr.bf16.mxu1 %v4045_v24  ;;  %v694_v24 = vrot.slane %v681_v48, %v4903_v21  ;;  %v4086_v48 = vld [vmem:[%s5850_s10 + $0x28] sm:$0xff]  }
  0x79   :  { %3776 = vmatpush3.bf16.msra.mxu1 %v4046_v25  ;;  %v4069_v25 = vld [vmem:[%s5846_s6 + $0xf0] sm:$0xff]  }
  0x7a   :  { %3777 = vmatprep.subr.bf16.mxu1 %v4047_v26  ;;  %v4070_v26 = vld [vmem:[%s5846_s6 + $0xb0] sm:$0xff]  }
  0x7d   :  { %3778 = vmatpush3.bf16.msra.mxu1 %v4048_v27 }
  0x7e   :  { %3779 = vmatprep.subr.bf16.mxu1 %v4049_v28  ;;  %v4071_v28 = vld [vmem:[%s5846_s6 + $0xf8] sm:$0xff]  }
  0x81   :  { %3780 = vmatpush3.bf16.msra.mxu1 %v4050_v29  ;;  %v4072_v29 = vld [vmem:[%s5846_s6 + $0xb8] sm:$0xff]  }
  0x82   :  { %3781 = vmatprep.subr.bf16.mxu1 %v4051_v30 }
  0x85   :  { %3782 = vmatpush3.bf16.msra.mxu1 %v4052_v31 }
  0x86   :  { %3783 = vmatprep.subr.bf16.mxu1 %v4053_v32  ;;  %v4073_v32 = vld [vmem:[%s5848_s8] sm:$0xff]  }
  0x89   :  { %3784 = vmatpush3.bf16.msra.mxu1 %v4054_v33  ;;  %v4473_v33 = vmov 0.0  }
  0x8a   :  { %3785 = vmatprep.subr.bf16.mxu1 %v4055_v34  ;;  %3877 = vmatprep.subr.bf16.mxu0 %v4473_v33  ;;  %v4074_v34 = vld [vmem:[%s5848_s8 + $0x8] sm:$0xff]  }
  0x8b   :  { %3878 = vmatpush3.bf16.msra.mxu0 %v4073_v32  ;;  %3893 = vmatprep.mubr.msk.bf16.mxu0 %vm4474_vm2, %v4473_v33  ;;  %v4106_v32 = vld [vmem:[%s5852_s12 + $0x4c] ss:$16 sps:$4 sm:$0xff]  }
  0x8c   :  { %3879 = vmatprep.subr.bf16.mxu0 %v4473_v33 }
  0x8d   :  { %3786 = vmatpush3.bf16.msra.mxu1 %v4056_v35  ;;  %v4075_v35 = vld [vmem:[%s5848_s8 + $0x10] sm:$0xff]  }
  0x8e   :  { %3793 = vmatprep.subr.bf16.mxu1 %v4057_v36  ;;  %v4076_v36 = vld [vmem:[%s5848_s8 + $0x18] sm:$0xff]  }
  0x8f   :  { %3880 = vmatpush3.bf16.msra.mxu0 %v4074_v34  ;;  %v4112_v34 = vld [vmem:[%s5852_s12 + $0x6c] ss:$16 sps:$4 sm:$0xff]  }
  0x90   :  { %3881 = vmatprep.subr.bf16.mxu0 %v4473_v33 }
  0x93   :  { %3882 = vmatpush3.bf16.msra.mxu0 %v4075_v35  ;;  %v4118_v35 = vld [vmem:[%s5852_s12 + $0x8c] ss:$16 sps:$4 sm:$0xff]  }
  0x94   :  { %3883 = vmatprep.subr.bf16.mxu0 %v4473_v33 }
  0x97   :  { %3884 = vmatpush3.bf16.msra.mxu0 %v4076_v36  ;;  %v4116_v36 = vld [vmem:[%s5852_s12 + $0x88] ss:$16 sps:$4 sm:$0xff]  }
  0x98   :  { %3885 = vmatprep.subr.bf16.mxu0 %v4473_v33 }
 0x103   :  { %v231_v37 = vpop.f32.mrb[0].mxu0  ;;  %v272_v38 = vpop.f32.mrb[0].mxu1 }
 0x104   :  { %v233_v39 = vpop.f32.mrb[1].mxu0  ;;  %v274_v40 = vpop.f32.mrb[1].mxu1 }
 0x105   :  { %v235_v41 = vpop.f32.mrb[2].mxu0  ;;  %v276_v42 = vpop.f32.mrb[2].mxu1 }
 0x106   :  { %v236_v43 = vpop.f32.mrb[3].mxu0  ;;  %v277_v44 = vpop.f32.mrb[3].mxu1  ;;  %v4081_v41 = vld [vmem:[%s5850_s10] sm:$0xff]   ;;  %v4082_v42 = vld [vmem:[%s5850_s10 + $0x8] sm:$0xff]  }
 0x107   :  { %v4083_v43 = vld [vmem:[%s5850_s10 + $0x10] sm:$0xff]   ;;  %v4084_v44 = vld [vmem:[%s5850_s10 + $0x18] sm:$0xff]  }
 0x143   :  { %v633_v52 = vpop.f32.mrb[4].mxu0  ;;  %v674_v53 = vpop.f32.mrb[4].mxu1 }
 0x144   :  { %v634_v56 = vadd.f32 %v633_v52, %v231_v37  ;;  %v675_v57 = vadd.f32 %v674_v53, %v272_v38  ;;  %v635_v58 = vpop.f32.mrb[5].mxu0  ;;  %v676_v59 = vpop.f32.mrb[5].mxu1  ;;  %v4077_v37 = vld [vmem:[%s5848_s8 + $0x20] sm:$0xff]   ;;  %v4078_v38 = vld [vmem:[%s5848_s8 + $0x28] sm:$0xff]  }
 0x145   :  { %v636_v60 = vadd.f32 %v635_v58, %v233_v39  ;;  %v677_v61 = vadd.f32 %v676_v59, %v274_v40  ;;  %v637_v62 = vpop.f32.mrb[6].mxu0  ;;  %v678_v63 = vpop.f32.mrb[6].mxu1  ;;  %3886 = vmatpush3.bf16.msra.mxu0 %v4077_v37  ;;  %v4079_v39 = vld [vmem:[%s5848_s8 + $0x30] sm:$0xff]   ;;  %v4080_v40 = vld [vmem:[%s5848_s8 + $0x38] sm:$0xff]  }
 0x146   :  { %v703_v0 = vadd.f32 %v686_v51, %v634_v56  ;;  %v638_v1 = vpop.f32.mrb[7].mxu0  ;;  %v679_v3 = vpop.f32.mrb[7].mxu1  ;;  %v705_v27 = vadd.f32 %v694_v24, %v675_v57  ;;  %3887 = vmatprep.subr.bf16.mxu0 %v4473_v33  ;;  %v3464_v56 = vld [vmem:[%s5847_s7] ss:$0 sm:$0xff]  ;;  %v4124_v37 = vld [vmem:[%s5852_s12 + $0xac] ss:$16 sps:$4 sm:$0xff]  }
 0x147   :  { %v704_v4 = vadd.f32 %v690_v54, %v636_v60  ;;  %v706_v5 = vadd.f32 %v698_v55, %v677_v61  ;;  %v4087_v3 = vld [vmem:[%s5850_s10 + $0x30] sm:$0xff]  }
 0x148   :  { %v707_v6 = vmax.f32 %v703_v0, 0.0  ;;  %v709_v30 = vmax.f32 %v705_v27, 0.0 }
 0x149   :  { %v708_v7 = vmax.f32 %v704_v4, 0.0  ;;  %v710_v8 = vmax.f32 %v706_v5, 0.0  ;;  %3888 = vmatpush3.bf16.msra.mxu0 %v4078_v38  ;;  %v4088_v4 = vld [vmem:[%s5850_s10 + $0x38] sm:$0xff]   ;;  %v4089_v5 = vld [vmem:[%s5852_s12] ss:$16 sps:$4 sm:$0xff]  }
 0x14a   :  { %v711_v11 = vpack.c.bf16 %v707_v6, %v707_v6  ;;  %v713_v31 = vpack.c.bf16 %v709_v30, %v709_v30  ;;  %3889 = vmatprep.subr.bf16.mxu0 %v4473_v33  ;;  %v4091_v6 = vld [vmem:[%s5852_s12 + $0x4] ss:$16 sps:$4 sm:$0xff]   ;;  %v4100_v30 = vld [vmem:[%s5852_s12 + $0x2c] ss:$16 sps:$4 sm:$0xff]   ;;  %v4122_v38 = vld [vmem:[%s5852_s12 + $0xa8] ss:$16 sps:$4 sm:$0xff]  }
 0x14b   :  { %v712_v9 = vpack.c.bf16 %v708_v7, %v708_v7  ;;  %v714_v13 = vpack.c.bf16 %v710_v8, %v710_v8  ;;  %v4094_v7 = vld [vmem:[%s5852_s12 + $0xc] ss:$16 sps:$4 sm:$0xff]   ;;  %v4097_v8 = vld [vmem:[%s5852_s12 + $0x24] ss:$16 sps:$4 sm:$0xff]  }
 0x14d   :  { %1010 = vmatprep.mubr.bf16.mxu1 %v712_v9  ;;  %3890 = vmatpush3.bf16.msra.mxu0 %v4079_v39  ;;  %v4095_v9 = vld [vmem:[%s5852_s12 + $0x20] ss:$16 sps:$4 sm:$0xff]   ;;  %v4130_v39 = vld [vmem:[%s5852_s12 + $0xcc] ss:$16 sps:$4 sm:$0xff]  }
 0x14e   :  { %1011 = vmatmul.mubr.bf16.vlgmr.msra.gmra.mrb[8].mxu1 %v711_v11  ;;  %3891 = vmatprep.subr.bf16.mxu0 %v4473_v33  ;;  %v4101_v11 = vld [vmem:[%s5852_s12 + $0x40] ss:$16 sps:$4 sm:$0xff]  }
 0x14f   :  { %3794 = vmatpush3.bf16.msra.mxu1 %v4058_v10  ;;  %1050 = vmatprep.mubr.bf16.mxu1 %v714_v13  ;;  %v4103_v10 = vld [vmem:[%s5852_s12 + $0x44] ss:$16 sps:$4 sm:$0xff]   ;;  %v4107_v13 = vld [vmem:[%s5852_s12 + $0x60] ss:$16 sps:$4 sm:$0xff]  }
 0x150   :  { %3795 = vmatprep.subr.bf16.mxu1 %v4059_v12  ;;  %v4109_v12 = vld [vmem:[%s5852_s12 + $0x64] ss:$16 sps:$4 sm:$0xff]  }
 0x151   :  { %3892 = vmatpush3.bf16.msra.mxu0 %v4080_v40  ;;  %v4128_v40 = vld [vmem:[%s5852_s12 + $0xc8] ss:$16 sps:$4 sm:$0xff]  }
 0x152   :  { %1500 = vmatprep.subr.bf16.mxu0 %v4091_v6  ;;  %v4157_v6 = vld [vmem:[%s5854_s14 + $0xac] ss:$28 sps:$4 sm:$0xff]  }
 0x153   :  { %3796 = vmatpush3.bf16.msra.mxu1 %v4060_v14  ;;  %v4115_v14 = vld [vmem:[%s5852_s12 + $0x84] ss:$16 sps:$4 sm:$0xff]  }
 0x154   :  { %3797 = vmatprep.subr.bf16.mxu1 %v4061_v15  ;;  %v4113_v15 = vld [vmem:[%s5852_s12 + $0x80] ss:$16 sps:$4 sm:$0xff]  }
 0x157   :  { %3798 = vmatpush3.bf16.msra.mxu1 %v4062_v16  ;;  %v4121_v16 = vld [vmem:[%s5852_s12 + $0xa4] ss:$16 sps:$4 sm:$0xff]  }
 0x158   :  { %3799 = vmatprep.subr.bf16.mxu1 %v4063_v17  ;;  %v4119_v17 = vld [vmem:[%s5852_s12 + $0xa0] ss:$16 sps:$4 sm:$0xff]  }
 0x15b   :  { %3800 = vmatpush3.bf16.msra.mxu1 %v4064_v18  ;;  %v4127_v18 = vld [vmem:[%s5852_s12 + $0xc4] ss:$16 sps:$4 sm:$0xff]  }
 0x15c   :  { %3801 = vmatprep.subr.bf16.mxu1 %v4065_v19  ;;  %v4125_v19 = vld [vmem:[%s5852_s12 + $0xc0] ss:$16 sps:$4 sm:$0xff]  }
 0x15f   :  { %3802 = vmatpush3.bf16.msra.mxu1 %v4066_v20  ;;  %v3497_v20 = vld [vmem:[%s5864_s2] ss:$0 sm:$0xff] }
 0x160   :  { %3803 = vmatprep.subr.bf16.mxu1 %v4067_v22 }
 0x163   :  { %3804 = vmatpush3.bf16.msra.mxu1 %v4068_v23 }
 0x164   :  { %3805 = vmatprep.subr.bf16.mxu1 %v4069_v25 }
 0x167   :  { %3806 = vmatpush3.bf16.msra.mxu1 %v4070_v26 }
 0x168   :  { %3807 = vmatprep.subr.bf16.mxu1 %v4071_v28  ;;  %v4092_v28 = vld [vmem:[%s5852_s12 + $0x8] ss:$16 sps:$4 sm:$0xff]  }
 0x16b   :  { %3808 = vmatpush3.bf16.msra.mxu1 %v4072_v29 }
 0x16c   :  { %3897 = vmatprep.subr.bf16.mxu1 %v4473_v33 }
 0x16e   :  { %1051 = vmatmul.mubr.bf16.vlgmr.msra.gmra.mrb[12].mxu1 %v713_v31  ;;  %v4098_v31 = vld [vmem:[%s5852_s12 + $0x28] ss:$16 sps:$4 sm:$0xff]  }
 0x16f   :  { %3913 = vmatprep.mubr.msk.bf16.mxu1 %vm4474_vm2, %v4473_v33  ;;  %3898 = vmatpush3.bf16.msra.mxu1 %v4081_v41  ;;  %v4133_v41 = vld [vmem:[%s5852_s12 + $0xe4] ss:$16 sps:$4 sm:$0xff]  }
 0x170   :  { %3899 = vmatprep.subr.bf16.mxu1 %v4473_v33 }
 0x173   :  { %3900 = vmatpush3.bf16.msra.mxu1 %v4082_v42  ;;  %v4136_v42 = vld [vmem:[%s5852_s12 + $0xec] ss:$16 sps:$4 sm:$0xff]  }
 0x174   :  { %3901 = vmatprep.subr.bf16.mxu1 %v4473_v33 }
 0x177   :  { %3902 = vmatpush3.bf16.msra.mxu1 %v4083_v43  ;;  %v4131_v43 = vld [vmem:[%s5852_s12 + $0xe0] ss:$16 sps:$4 sm:$0xff]  }
 0x178   :  { %3903 = vmatprep.subr.bf16.mxu1 %v4473_v33 }
 0x17b   :  { %3904 = vmatpush3.bf16.msra.mxu1 %v4084_v44  ;;  %v4134_v44 = vld [vmem:[%s5852_s12 + $0xe8] ss:$16 sps:$4 sm:$0xff]  }
 0x17c   :  { %3905 = vmatprep.subr.bf16.mxu1 %v4473_v33 }
 0x17f   :  { %3906 = vmatpush3.bf16.msra.mxu1 %v4085_v45  ;;  %v4139_v45 = vld [vmem:[%s5854_s14 + $0x4] ss:$28 sps:$4 sm:$0xff]  }
 0x180   :  { %3907 = vmatprep.subr.bf16.mxu1 %v4473_v33 }
 0x183   :  { %3908 = vmatpush3.bf16.msra.mxu1 %v4086_v48  ;;  %v4142_v48 = vld [vmem:[%s5854_s14 + $0xc] ss:$28 sps:$4 sm:$0xff]  }
 0x184   :  { %3909 = vmatprep.subr.bf16.mxu1 %v4473_v33 }
 0x187   :  { %3910 = vmatpush3.bf16.msra.mxu1 %v4087_v3  ;;  %v4154_v3 = vld [vmem:[%s5854_s14 + $0x7c] ss:$28 sps:$4 sm:$0xff]  }
 0x188   :  { %3911 = vmatprep.subr.bf16.mxu1 %v4473_v33  ;;  %v4104_v33 = vld [vmem:[%s5852_s12 + $0x48] ss:$16 sps:$4 sm:$0xff]  }
 0x18b   :  { %3912 = vmatpush3.bf16.msra.mxu1 %v4088_v4  ;;  %v4149_v4 = vld [vmem:[%s5854_s14 + $0x70] ss:$28 sps:$4 sm:$0xff]  }
 0x18c   :  { %1541 = vmatprep.subr.bf16.mxu1 %v4094_v7  ;;  %v4160_v7 = vld [vmem:[%s5854_s14 + $0xb4] ss:$28 sps:$4 sm:$0xff]  }
 0x221   :  { %v3787_v51 = vpop.f32.mrb[8].mxu1 }
 0x222   :  { %v3788_v52 = vpop.f32.mrb[9].mxu1 }
 0x223   :  { %v3789_v53 = vadd.f32 %v3788_v52, %v3787_v51  ;;  %v3790_v54 = vpop.f32.mrb[10].mxu1  ;;  %v3506_v51 = vld [vmem:[%s5851_s11] ss:$0 sm:$0xff] }
 0x224   :  { %v3791_v55 = vpop.f32.mrb[11].mxu1 }
 0x225   :  { %v1013_v59 = vadd.f32 %v3789_v53, %v3464_v56 }
 0x241   :  { %v3809_v57 = vpop.f32.mrb[12].mxu1 }
 0x242   :  { %v3810_v58 = vpop.f32.mrb[13].mxu1 }
 0x243   :  { %v3811_v60 = vadd.f32 %v3810_v58, %v3809_v57  ;;  %v3812_v61 = vpop.f32.mrb[14].mxu1  ;;  %v4137_v58 = vld [vmem:[%s5854_s14] ss:$28 sps:$4 sm:$0xff]  }
 0x244   :  { %v3813_v62 = vpop.f32.mrb[15].mxu1  ;;  %v4145_v61 = vld [vmem:[%s5854_s14 + $0x3c] ss:$28 sps:$4 sm:$0xff]  }
 0x245   :  { %v1053_v63 = vadd.f32 %v3811_v60, %v1013_v59  ;;  %v4140_v59 = vld [vmem:[%s5854_s14 + $0x8] ss:$28 sps:$4 sm:$0xff]  }
 0x246   :  { %v4148_v62 = vld [vmem:[%s5854_s14 + $0x44] ss:$28 sps:$4 sm:$0xff]  }
 0x247   :  { %v1058_v0 = vmax.f32 %v1053_v63, 0.0  ;;  %v4143_v63 = vld [vmem:[%s5854_s14 + $0x38] ss:$28 sps:$4 sm:$0xff]  }
 0x249   :  { %v1059_v1 = vpack.c.bf16 %v1058_v0, %v1058_v0  ;;  %v4146_v0 = vld [vmem:[%s5854_s14 + $0x40] ss:$28 sps:$4 sm:$0xff]  }
 0x24b   :  { %3894 = vmatmul.mubr.bf16.vlgmr.msra.gmra.mrb[8].mxu0 %v1059_v1  ;;  %v4151_v1 = vld [vmem:[%s5854_s14 + $0x74] ss:$28 sps:$4 sm:$0xff]  }
 0x24c   :  { %1532 = vmatprep.mubr.bf16.mxu0 %v4472_v2  ;;  %1501 = vmatpush1.bf16.msra.mxu0 %v4089_v5  ;;  %v4152_v5 = vld [vmem:[%s5854_s14 + $0x78] ss:$28 sps:$4 sm:$0xff]  }
 0x24d   :  { %1502 = vmatprep.subr.bf16.mxu0 %v4097_v8  ;;  %v4155_v8 = vld [vmem:[%s5854_s14 + $0xa8] ss:$28 sps:$4 sm:$0xff]  }
 0x250   :  { %1503 = vmatpush1.bf16.msra.mxu0 %v4095_v9  ;;  %v4158_v9 = vld [vmem:[%s5854_s14 + $0xb0] ss:$28 sps:$4 sm:$0xff]  }
 0x251   :  { %1504 = vmatprep.subr.bf16.mxu0 %v4103_v10  ;;  %v4163_v10 = vld [vmem:[%s5854_s14 + $0xe4] ss:$28 sps:$4 sm:$0xff]  }
 0x254   :  { %1505 = vmatpush1.bf16.msra.mxu0 %v4101_v11  ;;  %v4166_v11 = vld [vmem:[%s5854_s14 + $0xec] ss:$28 sps:$4 sm:$0xff]  }
 0x255   :  { %1506 = vmatprep.subr.bf16.mxu0 %v4109_v12  ;;  %v4161_v12 = vld [vmem:[%s5854_s14 + $0xe0] ss:$28 sps:$4 sm:$0xff]  }
 0x258   :  { %1507 = vmatpush1.bf16.msra.mxu0 %v4107_v13  ;;  %v4164_v13 = vld [vmem:[%s5854_s14 + $0xe8] ss:$28 sps:$4 sm:$0xff]  }
 0x259   :  { %1508 = vmatprep.subr.bf16.mxu0 %v4115_v14  ;;  %v4169_v14 = vld [vmem:[%s5854_s14 + $0x11c] ss:$28 sps:$4 sm:$0xff]  }
 0x25c   :  { %1509 = vmatpush1.bf16.msra.mxu0 %v4113_v15  ;;  %v4172_v15 = vld [vmem:[%s5854_s14 + $0x124] ss:$28 sps:$4 sm:$0xff]  }
 0x25d   :  { %1510 = vmatprep.subr.bf16.mxu0 %v4121_v16  ;;  %v4167_v16 = vld [vmem:[%s5854_s14 + $0x118] ss:$28 sps:$4 sm:$0xff]  }
 0x260   :  { %1511 = vmatpush1.bf16.msra.mxu0 %v4119_v17  ;;  %v4170_v17 = vld [vmem:[%s5854_s14 + $0x120] ss:$28 sps:$4 sm:$0xff]  }
 0x261   :  { %1512 = vmatprep.subr.bf16.mxu0 %v4127_v18  ;;  %v4175_v18 = vld [vmem:[%s5854_s14 + $0x154] ss:$28 sps:$4 sm:$0xff]  }
 0x264   :  { %1513 = vmatpush1.bf16.msra.mxu0 %v4125_v19  ;;  %v4178_v19 = vld [vmem:[%s5854_s14 + $0x15c] ss:$28 sps:$4 sm:$0xff]  }
 0x265   :  { %1514 = vmatprep.subr.bf16.mxu0 %v4133_v41  ;;  %v4206_v41 = vld [vmem:[%s5854_s14 + $0x270] ss:$28 sps:$4 sm:$0xff]  }
 0x268   :  { %1515 = vmatpush1.bf16.msra.mxu0 %v4131_v43  ;;  %v4214_v43 = vld [vmem:[%s5854_s14 + $0x2ac] ss:$28 sps:$4 sm:$0xff]  }
 0x269   :  { %3035 = vmatprep.subr.bf16.mxu0 %v4139_v45  ;;  %v4212_v45 = vld [vmem:[%s5854_s14 + $0x2a8] ss:$28 sps:$4 sm:$0xff]  }
 0x31e   :  { %v1165_v22 = vpop.f32.mrb[8].mxu0 }
 0x31f   :  { %v1166_v23 = vadd.f32 %v3497_v20, %v1165_v22  ;;  %v3895_v24 = vpop.f32.mrb[9].mxu0  ;;  %v4173_v20 = vld [vmem:[%s5854_s14 + $0x150] ss:$28 sps:$4 sm:$0xff]   ;;  %v4176_v22 = vld [vmem:[%s5854_s14 + $0x158] ss:$28 sps:$4 sm:$0xff]  }
 0x320   :  { %v1168_v25 = vpop.f32.mrb[10].mxu0  ;;  %v4184_v24 = vld [vmem:[%s5854_s14 + $0x194] ss:$28 sps:$4 sm:$0xff]  }
 0x321   :  { %v1171_v26 = vmax.f32 %v1166_v23, 0.0  ;;  %v3896_v27 = vpop.f32.mrb[11].mxu0  ;;  %v4181_v23 = vld [vmem:[%s5854_s14 + $0x18c] ss:$28 sps:$4 sm:$0xff]  }
 0x322   :  { %v4179_v25 = vld [vmem:[%s5854_s14 + $0x188] ss:$28 sps:$4 sm:$0xff]  }
 0x323   :  { %v1172_v29 = vpack.c.bf16 %v1171_v26, %v1171_v26  ;;  %v4182_v26 = vld [vmem:[%s5854_s14 + $0x190] ss:$28 sps:$4 sm:$0xff]   ;;  %v4187_v27 = vld [vmem:[%s5854_s14 + $0x1c4] ss:$28 sps:$4 sm:$0xff]  }
 0x325   :  { %3914 = vmatmul.mubr.bf16.vlgmr.msra.gmra.mrb[16].mxu1 %v1172_v29  ;;  %v4185_v29 = vld [vmem:[%s5854_s14 + $0x1c0] ss:$28 sps:$4 sm:$0xff]  }
 0x326   :  { %1542 = vmatpush1.bf16.msra.mxu1 %v4092_v28  ;;  %1573 = vmatprep.mubr.bf16.mxu1 %v4472_v2  ;;  %v4110_v2 = vld [vmem:[%s5852_s12 + $0x68] ss:$16 sps:$4 sm:$0xff]  }
 0x327   :  { %1543 = vmatprep.subr.bf16.mxu1 %v4100_v30  ;;  %v4190_v28 = vld [vmem:[%s5854_s14 + $0x1cc] ss:$28 sps:$4 sm:$0xff]  }
 0x328   :  { %v4188_v30 = vld [vmem:[%s5854_s14 + $0x1c8] ss:$28 sps:$4 sm:$0xff]  }
 0x32a   :  { %1544 = vmatpush1.bf16.msra.mxu1 %v4098_v31  ;;  %v4193_v31 = vld [vmem:[%s5854_s14 + $0x1fc] ss:$28 sps:$4 sm:$0xff]  }
 0x32b   :  { %1545 = vmatprep.subr.bf16.mxu1 %v4106_v32  ;;  %v4196_v32 = vld [vmem:[%s5854_s14 + $0x204] ss:$28 sps:$4 sm:$0xff]  }
 0x32e   :  { %1546 = vmatpush1.bf16.msra.mxu1 %v4104_v33  ;;  %v4191_v33 = vld [vmem:[%s5854_s14 + $0x1f8] ss:$28 sps:$4 sm:$0xff]  }
 0x32f   :  { %1547 = vmatprep.subr.bf16.mxu1 %v4112_v34  ;;  %v4194_v34 = vld [vmem:[%s5854_s14 + $0x200] ss:$28 sps:$4 sm:$0xff]  }
 0x332   :  { %1548 = vmatpush1.bf16.msra.mxu1 %v4110_v2  ;;  %v4199_v2 = vld [vmem:[%s5854_s14 + $0x234] ss:$28 sps:$4 sm:$0xff]  }
 0x333   :  { %1549 = vmatprep.subr.bf16.mxu1 %v4118_v35  ;;  %v4202_v35 = vld [vmem:[%s5854_s14 + $0x23c] ss:$28 sps:$4 sm:$0xff]  }
 0x336   :  { %1550 = vmatpush1.bf16.msra.mxu1 %v4116_v36  ;;  %v4197_v36 = vld [vmem:[%s5854_s14 + $0x230] ss:$28 sps:$4 sm:$0xff]  }
 0x337   :  { %1551 = vmatprep.subr.bf16.mxu1 %v4124_v37  ;;  %v4200_v37 = vld [vmem:[%s5854_s14 + $0x238] ss:$28 sps:$4 sm:$0xff]  }
 0x33a   :  { %1552 = vmatpush1.bf16.msra.mxu1 %v4122_v38  ;;  %v4205_v38 = vld [vmem:[%s5854_s14 + $0x26c] ss:$28 sps:$4 sm:$0xff]  }
 0x33b   :  { %1553 = vmatprep.subr.bf16.mxu1 %v4130_v39  ;;  %v4208_v39 = vld [vmem:[%s5854_s14 + $0x274] ss:$28 sps:$4 sm:$0xff]  }
 0x33e   :  { %1554 = vmatpush1.bf16.msra.mxu1 %v4128_v40  ;;  %v4203_v40 = vld [vmem:[%s5854_s14 + $0x268] ss:$28 sps:$4 sm:$0xff]  }
 0x33f   :  { %1555 = vmatprep.subr.bf16.mxu1 %v4136_v42  ;;  %v4211_v42 = vld [vmem:[%s5854_s14 + $0x2a4] ss:$28 sps:$4 sm:$0xff]  }
 0x342   :  { %1556 = vmatpush1.bf16.msra.mxu1 %v4134_v44  ;;  %v4209_v44 = vld [vmem:[%s5854_s14 + $0x2a0] ss:$28 sps:$4 sm:$0xff]  }
 0x343   :  { %3117 = vmatprep.subr.bf16.mxu1 %v4142_v48  ;;  %v4217_v48 = vld [vmem:[%s5854_s14 + $0x2dc] ss:$28 sps:$4 sm:$0xff]  }
 0x3f8   :  { %v1278_v52 = vpop.f32.mrb[16].mxu1 }
 0x3f9   :  { %v1279_v53 = vadd.f32 %v3506_v51, %v1278_v52  ;;  %v3915_v54 = vpop.f32.mrb[17].mxu1  ;;  %v4220_v51 = vld [vmem:[%s5854_s14 + $0x2e4] ss:$28 sps:$4 sm:$0xff]   ;;  %v4215_v52 = vld [vmem:[%s5854_s14 + $0x2d8] ss:$28 sps:$4 sm:$0xff]  }
 0x3fa   :  { %v1281_v55 = vpop.f32.mrb[18].mxu1  ;;  %v4223_v54 = vld [vmem:[%s5854_s14 + $0x314] ss:$28 sps:$4 sm:$0xff]  }
 0x3fb   :  { %v1284_v56 = vmax.f32 %v1279_v53, 0.0  ;;  %v3916_v57 = vpop.f32.mrb[19].mxu1  ;;  %v4218_v53 = vld [vmem:[%s5854_s14 + $0x2e0] ss:$28 sps:$4 sm:$0xff]  }
 0x3fc   :  { %v4226_v55 = vld [vmem:[%s5854_s14 + $0x31c] ss:$28 sps:$4 sm:$0xff]  }
 0x3fd   :  { %v1285_v60 = vpack.c.bf16 %v1284_v56, %v1284_v56  ;;  %v4221_v56 = vld [vmem:[%s5854_s14 + $0x310] ss:$28 sps:$4 sm:$0xff]   ;;  %v4224_v57 = vld [vmem:[%s5854_s14 + $0x318] ss:$28 sps:$4 sm:$0xff]  }
 0x3ff   :  { %1533 = vmatmul.mubr.bf16.vlgmr.msra.gmra.mrb[12].mxu0 %v1285_v60  ;;  %1574 = vmatmul.mubr.bf16.vlgmr.msra.gmra.mrb[20].mxu1 %v1285_v60  ;;  %v4227_v60 = vld [vmem:[%s5854_s14 + $0x348] ss:$28 sps:$4 sm:$0xff]  }
 0x400   :  { %3036 = vmatpush1.bf16.msra.mxu0 %v4137_v58  ;;  %3118 = vmatpush1.bf16.msra.mxu1 %v4140_v59  ;;  %v4229_v58 = vld [vmem:[%s5854_s14 + $0x34c] ss:$28 sps:$4 sm:$0xff]   ;;  %v4232_v59 = vld [vmem:[%s5854_s14 + $0x354] ss:$28 sps:$4 sm:$0xff]  }
 0x401   :  { %3037 = vmatprep.subr.bf16.mxu0 %v4145_v61  ;;  %3119 = vmatprep.subr.bf16.mxu1 %v4148_v62  ;;  %v4230_v61 = vld [vmem:[%s5854_s14 + $0x350] ss:$28 sps:$4 sm:$0xff]   ;;  %v4235_v62 = vld [vmem:[%s5854_s14 + $0x384] ss:$28 sps:$4 sm:$0xff]  }
 0x404   :  { %3038 = vmatpush1.bf16.msra.mxu0 %v4143_v63  ;;  %3120 = vmatpush1.bf16.msra.mxu1 %v4146_v0  ;;  %v4238_v63 = vld [vmem:[%s5854_s14 + $0x38c] ss:$28 sps:$4 sm:$0xff]   ;;  %v5298_v0 = vld [vmem:[%s5865_s18] sm:$0xf] }
 0x405   :  { %3039 = vmatprep.subr.bf16.mxu0 %v4151_v1  ;;  %3121 = vmatprep.subr.bf16.mxu1 %v4154_v3  ;;  %v1323_v1 = vrot.slane %v5298_v0, %v4861_v47  ;;  %v1327_v3 = vrot.slane %v5298_v0, %v4867_v49 }
 0x408   :  { %3040 = vmatpush1.bf16.msra.mxu0 %v4149_v4  ;;  %3122 = vmatpush1.bf16.msra.mxu1 %v4152_v5  ;;  %v1335_v4 = vrot.slane %v5298_v0, %v4870_v50 }
 0x409   :  { %3041 = vmatprep.subr.bf16.mxu0 %v4157_v6  ;;  %3123 = vmatprep.subr.bf16.mxu1 %v4160_v7 }
 0x40c   :  { %3042 = vmatpush1.bf16.msra.mxu0 %v4155_v8  ;;  %3124 = vmatpush1.bf16.msra.mxu1 %v4158_v9 }
 0x40d   :  { %3043 = vmatprep.subr.bf16.mxu0 %v4163_v10  ;;  %3125 = vmatprep.subr.bf16.mxu1 %v4166_v11 }
 0x410   :  { %3044 = vmatpush1.bf16.msra.mxu0 %v4161_v12  ;;  %3126 = vmatpush1.bf16.msra.mxu1 %v4164_v13 }
 0x411   :  { %3045 = vmatprep.subr.bf16.mxu0 %v4169_v14  ;;  %3127 = vmatprep.subr.bf16.mxu1 %v4172_v15 }
 0x414   :  { %3046 = vmatpush1.bf16.msra.mxu0 %v4167_v16  ;;  %3128 = vmatpush1.bf16.msra.mxu1 %v4170_v17 }
 0x415   :  { %3047 = vmatprep.subr.bf16.mxu0 %v4175_v18  ;;  %3129 = vmatprep.subr.bf16.mxu1 %v4178_v19 }
 0x418   :  { %3048 = vmatpush1.bf16.msra.mxu0 %v4173_v20  ;;  %3130 = vmatpush1.bf16.msra.mxu1 %v4176_v22  ;;  %v4233_v20 = vld [vmem:[%s5854_s14 + $0x380] ss:$28 sps:$4 sm:$0xff]   ;;  %v4236_v22 = vld [vmem:[%s5854_s14 + $0x388] ss:$28 sps:$4 sm:$0xff]  }
 0x419   :  { %3049 = vmatprep.subr.bf16.mxu0 %v4181_v23  ;;  %3131 = vmatprep.subr.bf16.mxu1 %v4184_v24  ;;  %v4241_v24 = vld [vmem:[%s5854_s14 + $0x3bc] ss:$28 sps:$4 sm:$0xff]  }
 0x41c   :  { %3050 = vmatpush1.bf16.msra.mxu0 %v4179_v25  ;;  %3132 = vmatpush1.bf16.msra.mxu1 %v4182_v26  ;;  %v4244_v25 = vld [vmem:[%s5854_s14 + $0x3c4] ss:$28 sps:$4 sm:$0xff]  }
 0x41d   :  { %3051 = vmatprep.subr.bf16.mxu0 %v4187_v27  ;;  %3133 = vmatprep.subr.bf16.mxu1 %v4190_v28  ;;  %v4239_v27 = vld [vmem:[%s5854_s14 + $0x3b8] ss:$28 sps:$4 sm:$0xff]   ;;  %v4242_v28 = vld [vmem:[%s5854_s14 + $0x3c0] ss:$28 sps:$4 sm:$0xff]  }
 0x420   :  { %3052 = vmatpush1.bf16.msra.mxu0 %v4185_v29  ;;  %3134 = vmatpush1.bf16.msra.mxu1 %v4188_v30  ;;  %v4247_v29 = vld [vmem:[%s5854_s14 + $0x3f4] ss:$28 sps:$4 sm:$0xff]   ;;  %v4250_v30 = vld [vmem:[%s5854_s14 + $0x3fc] ss:$28 sps:$4 sm:$0xff]  }
 0x421   :  { %3053 = vmatprep.subr.bf16.mxu0 %v4193_v31  ;;  %3135 = vmatprep.subr.bf16.mxu1 %v4196_v32  ;;  %v4245_v31 = vld [vmem:[%s5854_s14 + $0x3f0] ss:$28 sps:$4 sm:$0xff]   ;;  %v4248_v32 = vld [vmem:[%s5854_s14 + $0x3f8] ss:$28 sps:$4 sm:$0xff]  }
 0x424   :  { %3054 = vmatpush1.bf16.msra.mxu0 %v4191_v33  ;;  %3136 = vmatpush1.bf16.msra.mxu1 %v4194_v34  ;;  %v4253_v33 = vld [vmem:[%s5854_s14 + $0x42c] ss:$28 sps:$4 sm:$0xff]   ;;  %v4256_v34 = vld [vmem:[%s5854_s14 + $0x434] ss:$28 sps:$4 sm:$0xff]  }
 0x425   :  { %3055 = vmatprep.subr.bf16.mxu0 %v4199_v2  ;;  %3137 = vmatprep.subr.bf16.mxu1 %v4202_v35  ;;  %v4251_v2 = vld [vmem:[%s5854_s14 + $0x428] ss:$28 sps:$4 sm:$0xff]   ;;  %v4254_v35 = vld [vmem:[%s5854_s14 + $0x430] ss:$28 sps:$4 sm:$0xff]  }
 0x428   :  { %3056 = vmatpush1.bf16.msra.mxu0 %v4197_v36  ;;  %3138 = vmatpush1.bf16.msra.mxu1 %v4200_v37  ;;  %v4259_v36 = vld [vmem:[%s5854_s14 + $0x464] ss:$28 sps:$4 sm:$0xff]   ;;  %v4262_v37 = vld [vmem:[%s5854_s14 + $0x46c] ss:$28 sps:$4 sm:$0xff]  }
 0x429   :  { %3057 = vmatprep.subr.bf16.mxu0 %v4205_v38  ;;  %3139 = vmatprep.subr.bf16.mxu1 %v4208_v39  ;;  %v4257_v38 = vld [vmem:[%s5854_s14 + $0x460] ss:$28 sps:$4 sm:$0xff]   ;;  %v4260_v39 = vld [vmem:[%s5854_s14 + $0x468] ss:$28 sps:$4 sm:$0xff]  }
 0x42c   :  { %3058 = vmatpush1.bf16.msra.mxu0 %v4203_v40  ;;  %3140 = vmatpush1.bf16.msra.mxu1 %v4206_v41  ;;  %v4265_v40 = vld [vmem:[%s5854_s14 + $0x49c] ss:$28 sps:$4 sm:$0xff]   ;;  %v4268_v41 = vld [vmem:[%s5854_s14 + $0x4a4] ss:$28 sps:$4 sm:$0xff]  }
 0x42d   :  { %3059 = vmatprep.subr.bf16.mxu0 %v4211_v42  ;;  %3141 = vmatprep.subr.bf16.mxu1 %v4214_v43  ;;  %v4263_v42 = vld [vmem:[%s5854_s14 + $0x498] ss:$28 sps:$4 sm:$0xff]   ;;  %v4266_v43 = vld [vmem:[%s5854_s14 + $0x4a0] ss:$28 sps:$4 sm:$0xff]  }
 0x430   :  { %3060 = vmatpush1.bf16.msra.mxu0 %v4209_v44  ;;  %3142 = vmatpush1.bf16.msra.mxu1 %v4212_v45  ;;  %v4271_v44 = vld [vmem:[%s5854_s14 + $0x4d4] ss:$28 sps:$4 sm:$0xff]   ;;  %v4274_v45 = vld [vmem:[%s5854_s14 + $0x4dc] ss:$28 sps:$4 sm:$0xff]  }
 0x431   :  { %3061 = vmatprep.subr.bf16.mxu0 %v4217_v48  ;;  %3143 = vmatprep.subr.bf16.mxu1 %v4220_v51  ;;  %v4269_v48 = vld [vmem:[%s5854_s14 + $0x4d0] ss:$28 sps:$4 sm:$0xff]   ;;  %v4272_v51 = vld [vmem:[%s5854_s14 + $0x4d8] ss:$28 sps:$4 sm:$0xff]  }
 0x434   :  { %3062 = vmatpush1.bf16.msra.mxu0 %v4215_v52  ;;  %3144 = vmatpush1.bf16.msra.mxu1 %v4218_v53  ;;  %v4277_v52 = vld [vmem:[%s5854_s14 + $0x50c] ss:$28 sps:$4 sm:$0xff]   ;;  %v4280_v53 = vld [vmem:[%s5854_s14 + $0x514] ss:$28 sps:$4 sm:$0xff]  }
 0x435   :  { %3063 = vmatprep.subr.bf16.mxu0 %v4223_v54  ;;  %3145 = vmatprep.subr.bf16.mxu1 %v4226_v55  ;;  %v4275_v54 = vld [vmem:[%s5854_s14 + $0x508] ss:$28 sps:$4 sm:$0xff]   ;;  %v4278_v55 = vld [vmem:[%s5854_s14 + $0x510] ss:$28 sps:$4 sm:$0xff]  }
 0x438   :  { %3064 = vmatpush1.bf16.msra.mxu0 %v4221_v56  ;;  %3146 = vmatpush1.bf16.msra.mxu1 %v4224_v57  ;;  %v4283_v56 = vld [vmem:[%s5854_s14 + $0x544] ss:$28 sps:$4 sm:$0xff]   ;;  %v4286_v57 = vld [vmem:[%s5854_s14 + $0x54c] ss:$28 sps:$4 sm:$0xff]  }
 0x439   :  { %3065 = vmatprep.subr.bf16.mxu0 %v4229_v58  ;;  %3147 = vmatprep.subr.bf16.mxu1 %v4232_v59  ;;  %v4281_v58 = vld [vmem:[%s5854_s14 + $0x540] ss:$28 sps:$4 sm:$0xff]   ;;  %v4284_v59 = vld [vmem:[%s5854_s14 + $0x548] ss:$28 sps:$4 sm:$0xff]  }
 0x43c   :  { %3066 = vmatpush1.bf16.msra.mxu0 %v4227_v60  ;;  %3148 = vmatpush1.bf16.msra.mxu1 %v4230_v61  ;;  %v4289_v60 = vld [vmem:[%s5854_s14 + $0x57c] ss:$28 sps:$4 sm:$0xff]   ;;  %v4292_v61 = vld [vmem:[%s5854_s14 + $0x584] ss:$28 sps:$4 sm:$0xff]  }
 0x43d   :  { %3076 = vmatprep.subr.bf16.mxu0 %v4235_v62  ;;  %3158 = vmatprep.subr.bf16.mxu1 %v4238_v63  ;;  %v4287_v62 = vld [vmem:[%s5854_s14 + $0x578] ss:$28 sps:$4 sm:$0xff]   ;;  %v4290_v63 = vld [vmem:[%s5854_s14 + $0x580] ss:$28 sps:$4 sm:$0xff]  }
 0x4d2   :  { %v1534_v5 = vpop.f32.mrb[12].mxu0  ;;  %v5306_v6 = vpop.f32.mrb[20].mxu1 }
 0x4d3   :  { %v1535_v7 = vadd.f32 %v1534_v5, %v1323_v1  ;;  %v1536_v8 = vpop.f32.mrb[13].mxu0  ;;  %v1577_v9 = vpop.f32.mrb[21].mxu1  ;;  %v4295_v1 = vld [vmem:[%s5854_s14 + $0x5b4] ss:$28 sps:$4 sm:$0xff]  }
 0x4d4   :  { %v1537_v10 = vadd.f32 %v1536_v8, %v1327_v3  ;;  %v1578_v11 = vadd.f32 %v1577_v9, %v1335_v4  ;;  %v1538_v12 = vpop.f32.mrb[14].mxu0  ;;  %v1579_v13 = vpop.f32.mrb[22].mxu1  ;;  %v4298_v3 = vld [vmem:[%s5854_s14 + $0x5bc] ss:$28 sps:$4 sm:$0xff]   ;;  %v4293_v4 = vld [vmem:[%s5854_s14 + $0x5b0] ss:$28 sps:$4 sm:$0xff]  }
 0x4d5   :  { %v1582_v14 = vmax.f32 %v1535_v7, 0.0  ;;  %v1539_v15 = vpop.f32.mrb[15].mxu0  ;;  %v1580_v16 = vpop.f32.mrb[23].mxu1  ;;  %v4296_v5 = vld [vmem:[%s5854_s14 + $0x5b8] ss:$28 sps:$4 sm:$0xff]  }
 0x4d6   :  { %v1583_v17 = vmax.f32 %v1537_v10, 0.0  ;;  %v1585_v18 = vmax.f32 %v1578_v11, 0.0  ;;  %v4301_v7 = vld [vmem:[%s5854_s14 + $0x5ec] ss:$28 sps:$4 sm:$0xff]   ;;  %v4304_v8 = vld [vmem:[%s5854_s14 + $0x5f4] ss:$28 sps:$4 sm:$0xff]  }
 0x4d7   :  { %v5316_v23 = vpack.c.bf16 %v1582_v14, %v1582_v14  ;;  %v4299_v9 = vld [vmem:[%s5854_s14 + $0x5e8] ss:$28 sps:$4 sm:$0xff]   ;;  %v4302_v10 = vld [vmem:[%s5854_s14 + $0x5f0] ss:$28 sps:$4 sm:$0xff]   ;;  %v4305_v13 = vld [vmem:[%s5854_s14 + $0x620] ss:$28 sps:$4 sm:$0xff]  }
 0x4d8   :  { %v5308_v19 = vpack.c.bf16 %v1583_v17, %v1583_v17  ;;  %v5326_v26 = vpack.c.bf16 %v1585_v18, %v1585_v18  ;;  %v4307_v11 = vld [vmem:[%s5854_s14 + $0x624] ss:$28 sps:$4 sm:$0xff]   ;;  %v4310_v12 = vld [vmem:[%s5854_s14 + $0x62c] ss:$28 sps:$4 sm:$0xff]   ;;  %v4313_v15 = vld [vmem:[%s5854_s14 + $0x65c] ss:$28 sps:$4 sm:$0xff]  }
 0x4d9   :  { %v4308_v14 = vld [vmem:[%s5854_s14 + $0x628] ss:$28 sps:$4 sm:$0xff]   ;;  %v4311_v17 = vld [vmem:[%s5854_s14 + $0x658] ss:$28 sps:$4 sm:$0xff]   ;;  %v4314_v18 = vld [vmem:[%s5854_s14 + $0x660] ss:$28 sps:$4 sm:$0xff]  }
 0x4da   :  { %3067 = vmatprep.mubr.bf16.mxu0 %v5308_v19  ;;  %3149 = vmatprep.mubr.bf16.mxu1 %v5308_v19  ;;  %v4316_v16 = vld [vmem:[%s5854_s14 + $0x664] ss:$28 sps:$4 sm:$0xff]  }
 0x4db   :  { %3068 = vmatmul.mubr.bf16.vlgmr.msra.gmra.mrb[16].mxu0 %v5316_v23  ;;  %3150 = vmatmul.mubr.bf16.vlgmr.msra.gmra.mrb[24].mxu1 %v5316_v23 }
 0x4dc   :  { %3077 = vmatpush1.bf16.msra.mxu0 %v4233_v20  ;;  %3159 = vmatpush1.bf16.msra.mxu1 %v4236_v22  ;;  %v1331_v20 = vrot.slane %v5298_v0, %v4903_v21  ;;  %v4319_v22 = vld [vmem:[%s5854_s14 + $0x694] ss:$28 sps:$4 sm:$0xff]  }
 0x4dd   :  { %3108 = vmatprep.mubr.bf16.mxu0 %v5326_v26  ;;  %3190 = vmatprep.mubr.bf16.mxu1 %v5326_v26  ;;  %v4320_v0 = vld [vmem:[%s5854_s14 + $0x698] ss:$28 sps:$4 sm:$0xff]  }
 0x4de   :  { %3078 = vmatprep.subr.bf16.mxu0 %v4241_v24  ;;  %3160 = vmatprep.subr.bf16.mxu1 %v4244_v25  ;;  %v4322_v24 = vld [vmem:[%s5854_s14 + $0x69c] ss:$28 sps:$4 sm:$0xff]   ;;  %v4317_v25 = vld [vmem:[%s5854_s14 + $0x690] ss:$28 sps:$4 sm:$0xff]  }
 0x4e0   :  { %3079 = vmatpush1.bf16.msra.mxu0 %v4239_v27  ;;  %3161 = vmatpush1.bf16.msra.mxu1 %v4242_v28  ;;  %v1576_v27 = vadd.f32 %v5306_v6, %v1331_v20  ;;  %v4325_v28 = vld [vmem:[%s5854_s14 + $0x6cc] ss:$28 sps:$4 sm:$0xff]   ;;  %v4387_v20 = vld [vmem:[%s5854_s14 + $0x600] ss:$28 sps:$4 sm:$0xff]  }
 0x4e1   :  { %3080 = vmatprep.subr.bf16.mxu0 %v4247_v29  ;;  %3162 = vmatprep.subr.bf16.mxu1 %v4250_v30  ;;  %v4328_v29 = vld [vmem:[%s5854_s14 + $0x6d4] ss:$28 sps:$4 sm:$0xff]   ;;  %v4323_v30 = vld [vmem:[%s5854_s14 + $0x6c8] ss:$28 sps:$4 sm:$0xff]  }
 0x4e2   :  { %v4326_v6 = vld [vmem:[%s5854_s14 + $0x6d0] ss:$28 sps:$4 sm:$0xff]  }
 0x4e4   :  { %3081 = vmatpush1.bf16.msra.mxu0 %v4245_v31  ;;  %3163 = vmatpush1.bf16.msra.mxu1 %v4248_v32  ;;  %v1584_v31 = vmax.f32 %v1576_v27, 0.0  ;;  %v4331_v32 = vld [vmem:[%s5854_s14 + $0x14] ss:$28 sps:$4 sm:$0xff]  }
 0x4e5   :  { %3082 = vmatprep.subr.bf16.mxu0 %v4253_v33  ;;  %3164 = vmatprep.subr.bf16.mxu1 %v4256_v34  ;;  %v4332_v33 = vld [vmem:[%s5854_s14 + $0x1d8] ss:$28 sps:$4 sm:$0xff]   ;;  %v4329_v34 = vld [vmem:[%s5854_s14 + $0x10] ss:$28 sps:$4 sm:$0xff]  }
 0x4e6   :  { %v4389_v27 = vld [vmem:[%s5854_s14 + $0x2b0] ss:$28 sps:$4 sm:$0xff]  }
 0x4e8   :  { %3083 = vmatpush1.bf16.msra.mxu0 %v4251_v2  ;;  %3165 = vmatpush1.bf16.msra.mxu1 %v4254_v35  ;;  %v5518_v2 = vpack.c.bf16 %v1584_v31, %v1584_v31  ;;  %v4333_v35 = vld [vmem:[%s5854_s14 + $0x18] ss:$28 sps:$4 sm:$0xff]   ;;  %v4398_v31 = vld [vmem:[%s5854_s14 + $0x4b0] ss:$28 sps:$4 sm:$0xff]  }
 0x4e9   :  { %3084 = vmatprep.subr.bf16.mxu0 %v4259_v36  ;;  %3166 = vmatprep.subr.bf16.mxu1 %v4262_v37  ;;  %v4336_v36 = vld [vmem:[%s5854_s14 + $0x4c] ss:$28 sps:$4 sm:$0xff]  }
 0x4ea   :  { %v4337_v37 = vld [vmem:[%s5854_s14 + $0x210] ss:$28 sps:$4 sm:$0xff]  }
 0x4ec   :  { %3085 = vmatpush1.bf16.msra.mxu0 %v4257_v38  ;;  %3167 = vmatpush1.bf16.msra.mxu1 %v4260_v39  ;;  %v4334_v38 = vld [vmem:[%s5854_s14 + $0x48] ss:$28 sps:$4 sm:$0xff]   ;;  %v4338_v39 = vld [vmem:[%s5854_s14 + $0x50] ss:$28 sps:$4 sm:$0xff]  }
 0x4ed   :  { %3086 = vmatprep.subr.bf16.mxu0 %v4265_v40  ;;  %3168 = vmatprep.subr.bf16.mxu1 %v4268_v41  ;;  %v4341_v40 = vld [vmem:[%s5854_s14 + $0x84] ss:$28 sps:$4 sm:$0xff]  }
 0x4ee   :  { %v4342_v41 = vld [vmem:[%s5854_s14 + $0x248] ss:$28 sps:$4 sm:$0xff]  }
 0x4f0   :  { %3087 = vmatpush1.bf16.msra.mxu0 %v4263_v42  ;;  %3169 = vmatpush1.bf16.msra.mxu1 %v4266_v43  ;;  %v4339_v42 = vld [vmem:[%s5854_s14 + $0x80] ss:$28 sps:$4 sm:$0xff]  }
 0x4f1   :  { %3088 = vmatprep.subr.bf16.mxu0 %v4271_v44  ;;  %3170 = vmatprep.subr.bf16.mxu1 %v4274_v45  ;;  %v4346_v43 = vld [vmem:[%s5854_s14 + $0xbc] ss:$28 sps:$4 sm:$0xff]  }
 0x4f2   :  { %v4347_v44 = vld [vmem:[%s5854_s14 + $0x280] ss:$28 sps:$4 sm:$0xff]   ;;  %v4344_v45 = vld [vmem:[%s5854_s14 + $0xb8] ss:$28 sps:$4 sm:$0xff]  }
 0x4f4   :  { %3089 = vmatpush1.bf16.msra.mxu0 %v4269_v48  ;;  %3171 = vmatpush1.bf16.msra.mxu1 %v4272_v51  ;;  %v4348_v48 = vld [vmem:[%s5854_s14 + $0xc0] ss:$28 sps:$4 sm:$0xff]   ;;  %v4351_v51 = vld [vmem:[%s5854_s14 + $0xf4] ss:$28 sps:$4 sm:$0xff]  }
 0x4f5   :  { %3090 = vmatprep.subr.bf16.mxu0 %v4277_v52  ;;  %3172 = vmatprep.subr.bf16.mxu1 %v4280_v53  ;;  %v4352_v52 = vld [vmem:[%s5854_s14 + $0x2b8] ss:$28 sps:$4 sm:$0xff]   ;;  %v4349_v53 = vld [vmem:[%s5854_s14 + $0xf0] ss:$28 sps:$4 sm:$0xff]  }
 0x4f8   :  { %3091 = vmatpush1.bf16.msra.mxu0 %v4275_v54  ;;  %3173 = vmatpush1.bf16.msra.mxu1 %v4278_v55  ;;  %v4353_v54 = vld [vmem:[%s5854_s14 + $0xf8] ss:$28 sps:$4 sm:$0xff]   ;;  %v4356_v55 = vld [vmem:[%s5854_s14 + $0x12c] ss:$28 sps:$4 sm:$0xff]  }
 0x4f9   :  { %3092 = vmatprep.subr.bf16.mxu0 %v4283_v56  ;;  %3174 = vmatprep.subr.bf16.mxu1 %v4286_v57  ;;  %v4357_v56 = vld [vmem:[%s5854_s14 + $0x2f0] ss:$28 sps:$4 sm:$0xff]   ;;  %v4354_v57 = vld [vmem:[%s5854_s14 + $0x128] ss:$28 sps:$4 sm:$0xff]  }
 0x4fc   :  { %3093 = vmatpush1.bf16.msra.mxu0 %v4281_v58  ;;  %3175 = vmatpush1.bf16.msra.mxu1 %v4284_v59  ;;  %v4358_v58 = vld [vmem:[%s5854_s14 + $0x130] ss:$28 sps:$4 sm:$0xff]   ;;  %v4361_v59 = vld [vmem:[%s5854_s14 + $0x164] ss:$28 sps:$4 sm:$0xff]  }
 0x4fd   :  { %3094 = vmatprep.subr.bf16.mxu0 %v4289_v60  ;;  %3176 = vmatprep.subr.bf16.mxu1 %v4292_v61  ;;  %v4362_v60 = vld [vmem:[%s5854_s14 + $0x328] ss:$28 sps:$4 sm:$0xff]   ;;  %v4359_v61 = vld [vmem:[%s5854_s14 + $0x160] ss:$28 sps:$4 sm:$0xff]  }
 0x500   :  { %3095 = vmatpush1.bf16.msra.mxu0 %v4287_v62  ;;  %3177 = vmatpush1.bf16.msra.mxu1 %v4290_v63  ;;  %v4363_v62 = vld [vmem:[%s5854_s14 + $0x168] ss:$28 sps:$4 sm:$0xff]   ;;  %v4366_v63 = vld [vmem:[%s5854_s14 + $0x19c] ss:$28 sps:$4 sm:$0xff]  }
 0x501   :  { %3096 = vmatprep.subr.bf16.mxu0 %v4295_v1  ;;  %3178 = vmatprep.subr.bf16.mxu1 %v4298_v3  ;;  %v4367_v1 = vld [vmem:[%s5854_s14 + $0x360] ss:$28 sps:$4 sm:$0xff]   ;;  %v4364_v3 = vld [vmem:[%s5854_s14 + $0x198] ss:$28 sps:$4 sm:$0xff]  }
 0x504   :  { %3097 = vmatpush1.bf16.msra.mxu0 %v4293_v4  ;;  %3179 = vmatpush1.bf16.msra.mxu1 %v4296_v5  ;;  %v4368_v4 = vld [vmem:[%s5854_s14 + $0x1a0] ss:$28 sps:$4 sm:$0xff]   ;;  %v4371_v5 = vld [vmem:[%s5854_s14 + $0x1d4] ss:$28 sps:$4 sm:$0xff]  }
 0x505   :  { %3098 = vmatprep.subr.bf16.mxu0 %v4301_v7  ;;  %3180 = vmatprep.subr.bf16.mxu1 %v4304_v8  ;;  %v4372_v7 = vld [vmem:[%s5854_s14 + $0x558] ss:$28 sps:$4 sm:$0xff]   ;;  %v4369_v8 = vld [vmem:[%s5854_s14 + $0x1d0] ss:$28 sps:$4 sm:$0xff]  }
 0x508   :  { %3099 = vmatpush1.bf16.msra.mxu0 %v4299_v9  ;;  %3181 = vmatpush1.bf16.msra.mxu1 %v4302_v10  ;;  %v4373_v9 = vld [vmem:[%s5854_s14 + $0x398] ss:$28 sps:$4 sm:$0xff]   ;;  %v4376_v10 = vld [vmem:[%s5854_s14 + $0x20c] ss:$28 sps:$4 sm:$0xff]  }
 0x509   :  { %3100 = vmatprep.subr.bf16.mxu0 %v4307_v11  ;;  %3182 = vmatprep.subr.bf16.mxu1 %v4310_v12  ;;  %v4377_v11 = vld [vmem:[%s5854_s14 + $0x590] ss:$28 sps:$4 sm:$0xff]   ;;  %v4374_v12 = vld [vmem:[%s5854_s14 + $0x208] ss:$28 sps:$4 sm:$0xff]  }
 0x50c   :  { %3101 = vmatpush1.bf16.msra.mxu0 %v4305_v13  ;;  %3183 = vmatpush1.bf16.msra.mxu1 %v4308_v14  ;;  %v4378_v13 = vld [vmem:[%s5854_s14 + $0x3d0] ss:$28 sps:$4 sm:$0xff]   ;;  %v4381_v14 = vld [vmem:[%s5854_s14 + $0x244] ss:$28 sps:$4 sm:$0xff]  }
 0x50d   :  { %3102 = vmatprep.subr.bf16.mxu0 %v4313_v15  ;;  %3184 = vmatprep.subr.bf16.mxu1 %v4316_v16  ;;  %v4382_v15 = vld [vmem:[%s5854_s14 + $0x5c8] ss:$28 sps:$4 sm:$0xff]   ;;  %v4379_v16 = vld [vmem:[%s5854_s14 + $0x240] ss:$28 sps:$4 sm:$0xff]  }
 0x510   :  { %3103 = vmatpush1.bf16.msra.mxu0 %v4311_v17  ;;  %3185 = vmatpush1.bf16.msra.mxu1 %v4314_v18  ;;  %v4383_v17 = vld [vmem:[%s5854_s14 + $0x408] ss:$28 sps:$4 sm:$0xff]   ;;  %v4386_v18 = vld [vmem:[%s5854_s14 + $0x27c] ss:$28 sps:$4 sm:$0xff]  }
 0x511   :  { %3104 = vmatprep.subr.bf16.mxu0 %v4319_v22  ;;  %3186 = vmatprep.subr.bf16.mxu1 %v4322_v24  ;;  %v4384_v22 = vld [vmem:[%s5854_s14 + $0x278] ss:$28 sps:$4 sm:$0xff]   ;;  %v4388_v24 = vld [vmem:[%s5854_s14 + $0x440] ss:$28 sps:$4 sm:$0xff]  }
 0x514   :  { %3105 = vmatpush1.bf16.msra.mxu0 %v4317_v25  ;;  %3187 = vmatpush1.bf16.msra.mxu1 %v4320_v0  ;;  %v4391_v25 = vld [vmem:[%s5854_s14 + $0x2b4] ss:$28 sps:$4 sm:$0xff]  }
 0x515   :  { %3106 = vmatprep.subr.bf16.mxu0 %v4325_v28  ;;  %3188 = vmatprep.subr.bf16.mxu1 %v4328_v29  ;;  %v4392_v0 = vld [vmem:[%s5854_s14 + $0x638] ss:$28 sps:$4 sm:$0xff]   ;;  %v4396_v29 = vld [vmem:[%s5854_s14 + $0x2ec] ss:$28 sps:$4 sm:$0xff]  }
 0x516   :  { %v4393_v28 = vld [vmem:[%s5854_s14 + $0x478] ss:$28 sps:$4 sm:$0xff]  }
 0x518   :  { %3107 = vmatpush1.bf16.msra.mxu0 %v4323_v30  ;;  %3189 = vmatpush1.bf16.msra.mxu1 %v4326_v6  ;;  %v4397_v30 = vld [vmem:[%s5854_s14 + $0x670] ss:$28 sps:$4 sm:$0xff]   ;;  %v4394_v6 = vld [vmem:[%s5854_s14 + $0x2e8] ss:$28 sps:$4 sm:$0xff]  }
 0x519   :  { %3199 = vmatprep.subr.bf16.mxu0 %v4331_v32  ;;  %3833 = vmatprep.subr.bf16.mxu1 %v4332_v33  ;;  %v4401_v32 = vld [vmem:[%s5854_s14 + $0x324] ss:$28 sps:$4 sm:$0xff]  }
 0x51a   :  { %v4402_v33 = vld [vmem:[%s5854_s14 + $0x6a8] ss:$28 sps:$4 sm:$0xff]  }
 0x51b   :  { %3109 = vmatmul.mubr.bf16.vlgmr.msra.gmra.mrb[16].mxu0 %v5518_v2  ;;  %3191 = vmatmul.mubr.bf16.vlgmr.msra.gmra.mrb[24].mxu1 %v5518_v2 }
 0x51c   :  { %3200 = vmatpush1.bf16.msra.mxu0 %v4329_v34  ;;  %3231 = vmatprep.mubr.bf16.mxu0 %v5308_v19  ;;  %v4399_v34 = vld [vmem:[%s5854_s14 + $0x320] ss:$28 sps:$4 sm:$0xff]  }
 0x51d   :  { %3834 = vmatpush3.bf16.msra.mxu1 %v4333_v35  ;;  %3313 = vmatprep.mubr.bf16.mxu1 %v5308_v19  ;;  %v4343_v19 = vld [vmem:[%s5854_s14 + $0x88] ss:$28 sps:$4 sm:$0xff]  }
 0x51e   :  { %3201 = vmatprep.subr.bf16.mxu0 %v4336_v36  ;;  %3835 = vmatprep.subr.bf16.mxu1 %v4337_v37  ;;  %v4403_v35 = vld [vmem:[%s5854_s14 + $0x4e8] ss:$28 sps:$4 sm:$0xff]   ;;  %v4406_v36 = vld [vmem:[%s5854_s14 + $0x35c] ss:$28 sps:$4 sm:$0xff]  }
 0x51f   :  { %v4407_v37 = vld [vmem:[%s5854_s14 + $0x6e0] ss:$28 sps:$4 sm:$0xff]  }
 0x520   :  { %3202 = vmatpush1.bf16.msra.mxu0 %v4334_v38  ;;  %v4404_v38 = vld [vmem:[%s5854_s14 + $0x358] ss:$28 sps:$4 sm:$0xff]  }
 0x521   :  { %3836 = vmatpush3.bf16.msra.mxu1 %v4338_v39  ;;  %3203 = vmatprep.subr.bf16.mxu0 %v4341_v40  ;;  %v4408_v39 = vld [vmem:[%s5854_s14 + $0x520] ss:$28 sps:$4 sm:$0xff]   ;;  %v4411_v40 = vld [vmem:[%s5854_s14 + $0x394] ss:$28 sps:$4 sm:$0xff]  }
 0x522   :  { %3837 = vmatprep.subr.bf16.mxu1 %v4342_v41  ;;  %v4409_v41 = vld [vmem:[%s5854_s14 + $0x390] ss:$28 sps:$4 sm:$0xff]  }
 0x524   :  { %3204 = vmatpush1.bf16.msra.mxu0 %v4339_v42  ;;  %v4414_v42 = vld [vmem:[%s5854_s14 + $0x3cc] ss:$28 sps:$4 sm:$0xff]  }
 0x525   :  { %3838 = vmatpush3.bf16.msra.mxu1 %v4343_v19  ;;  %3205 = vmatprep.subr.bf16.mxu0 %v4346_v43  ;;  %v4412_v19 = vld [vmem:[%s5854_s14 + $0x3c8] ss:$28 sps:$4 sm:$0xff]  }
 0x526   :  { %3839 = vmatprep.subr.bf16.mxu1 %v4347_v44  ;;  %v4417_v43 = vld [vmem:[%s5854_s14 + $0x404] ss:$28 sps:$4 sm:$0xff]  }
 0x527   :  { %v4415_v44 = vld [vmem:[%s5854_s14 + $0x400] ss:$28 sps:$4 sm:$0xff]  }
 0x528   :  { %3206 = vmatpush1.bf16.msra.mxu0 %v4344_v45  ;;  %v4423_v45 = vld [vmem:[%s5854_s14 + $0x474] ss:$28 sps:$4 sm:$0xff]  }
 0x529   :  { %3840 = vmatpush3.bf16.msra.mxu1 %v4348_v48  ;;  %3207 = vmatprep.subr.bf16.mxu0 %v4351_v51  ;;  %v4421_v48 = vld [vmem:[%s5854_s14 + $0x470] ss:$28 sps:$4 sm:$0xff]  }
 0x52a   :  { %3841 = vmatprep.subr.bf16.mxu1 %v4352_v52  ;;  %v4426_v51 = vld [vmem:[%s5854_s14 + $0x4ac] ss:$28 sps:$4 sm:$0xff]  }
 0x52b   :  { %v4424_v52 = vld [vmem:[%s5854_s14 + $0x4a8] ss:$28 sps:$4 sm:$0xff]  }
 0x52c   :  { %3208 = vmatpush1.bf16.msra.mxu0 %v4349_v53  ;;  %v4429_v53 = vld [vmem:[%s5854_s14 + $0x4e4] ss:$28 sps:$4 sm:$0xff]  }
 0x52d   :  { %3842 = vmatpush3.bf16.msra.mxu1 %v4353_v54  ;;  %3209 = vmatprep.subr.bf16.mxu0 %v4356_v55  ;;  %v4427_v54 = vld [vmem:[%s5854_s14 + $0x4e0] ss:$28 sps:$4 sm:$0xff]  }
 0x52e   :  { %3843 = vmatprep.subr.bf16.mxu1 %v4357_v56  ;;  %v4432_v55 = vld [vmem:[%s5854_s14 + $0x51c] ss:$28 sps:$4 sm:$0xff]  }
 0x52f   :  { %v4430_v56 = vld [vmem:[%s5854_s14 + $0x518] ss:$28 sps:$4 sm:$0xff]  }
 0x530   :  { %3210 = vmatpush1.bf16.msra.mxu0 %v4354_v57  ;;  %v4435_v57 = vld [vmem:[%s5854_s14 + $0x554] ss:$28 sps:$4 sm:$0xff]  }
 0x531   :  { %3844 = vmatpush3.bf16.msra.mxu1 %v4358_v58  ;;  %3211 = vmatprep.subr.bf16.mxu0 %v4361_v59  ;;  %v4433_v58 = vld [vmem:[%s5854_s14 + $0x550] ss:$28 sps:$4 sm:$0xff]  }
 0x532   :  { %3845 = vmatprep.subr.bf16.mxu1 %v4362_v60  ;;  %v4438_v59 = vld [vmem:[%s5854_s14 + $0x58c] ss:$28 sps:$4 sm:$0xff]  }
 0x533   :  { %v4436_v60 = vld [vmem:[%s5854_s14 + $0x588] ss:$28 sps:$4 sm:$0xff]  }
 0x534   :  { %3212 = vmatpush1.bf16.msra.mxu0 %v4359_v61  ;;  %v4441_v61 = vld [vmem:[%s5854_s14 + $0x5c4] ss:$28 sps:$4 sm:$0xff]  }
 0x535   :  { %3846 = vmatpush3.bf16.msra.mxu1 %v4363_v62  ;;  %3213 = vmatprep.subr.bf16.mxu0 %v4366_v63  ;;  %v4439_v62 = vld [vmem:[%s5854_s14 + $0x5c0] ss:$28 sps:$4 sm:$0xff]  }
 0x536   :  { %3847 = vmatprep.subr.bf16.mxu1 %v4367_v1  ;;  %v4444_v63 = vld [vmem:[%s5854_s14 + $0x5fc] ss:$28 sps:$4 sm:$0xff]  }
 0x537   :  { %v4442_v1 = vld [vmem:[%s5854_s14 + $0x5f8] ss:$28 sps:$4 sm:$0xff]  }
 0x538   :  { %3214 = vmatpush1.bf16.msra.mxu0 %v4364_v3  ;;  %v4447_v3 = vld [vmem:[%s5854_s14 + $0x634] ss:$28 sps:$4 sm:$0xff]  }
 0x539   :  { %3848 = vmatpush3.bf16.msra.mxu1 %v4368_v4  ;;  %3215 = vmatprep.subr.bf16.mxu0 %v4371_v5  ;;  %v4445_v4 = vld [vmem:[%s5854_s14 + $0x630] ss:$28 sps:$4 sm:$0xff]  }
 0x53a   :  { %3855 = vmatprep.subr.bf16.mxu1 %v4372_v7  ;;  %v4450_v5 = vld [vmem:[%s5854_s14 + $0x66c] ss:$28 sps:$4 sm:$0xff]  }
 0x53b   :  { %v4448_v7 = vld [vmem:[%s5854_s14 + $0x668] ss:$28 sps:$4 sm:$0xff]  }
 0x53c   :  { %3314 = vmatmul.mubr.bf16.vlgmr.msra.gmra.mrb[28].mxu1 %v5316_v23  ;;  %3216 = vmatpush1.bf16.msra.mxu0 %v4369_v8  ;;  %v4453_v8 = vld [vmem:[%s5854_s14 + $0x6a4] ss:$28 sps:$4 sm:$0xff]  }
 0x53d   :  { %3856 = vmatpush3.bf16.msra.mxu1 %v4373_v9  ;;  %3353 = vmatprep.mubr.bf16.mxu1 %v5326_v26  ;;  %v4451_v9 = vld [vmem:[%s5854_s14 + $0x6a0] ss:$28 sps:$4 sm:$0xff]  }
 0x53e   :  { %3217 = vmatprep.subr.bf16.mxu0 %v4376_v10  ;;  %3857 = vmatprep.subr.bf16.mxu1 %v4377_v11  ;;  %v4456_v10 = vld [vmem:[%s5854_s14 + $0x6dc] ss:$28 sps:$4 sm:$0xff]  }
 0x53f   :  { %v4454_v11 = vld [vmem:[%s5854_s14 + $0x6d8] ss:$28 sps:$4 sm:$0xff]  }
 0x540   :  { %3218 = vmatpush1.bf16.msra.mxu0 %v4374_v12  ;;  %v1846_v12 = vld [vmem:[%s5866_s21] sm:$0xff] }
 0x541   :  { %3858 = vmatpush3.bf16.msra.mxu1 %v4378_v13  ;;  %3219 = vmatprep.subr.bf16.mxu0 %v4381_v14  ;;  %v1851_v13 = vrot.slane %v1846_v12, %v4861_v47  ;;  %v1859_v14 = vrot.slane %v1846_v12, %v4903_v21 }
 0x542   :  { %3859 = vmatprep.subr.bf16.mxu1 %v4382_v15  ;;  %v1855_v15 = vrot.slane %v1846_v12, %v4867_v49 }
 0x544   :  { %3220 = vmatpush1.bf16.msra.mxu0 %v4379_v16  ;;  %v1863_v16 = vrot.slane %v1846_v12, %v4870_v50 }
 0x545   :  { %3860 = vmatpush3.bf16.msra.mxu1 %v4383_v17  ;;  %3221 = vmatprep.subr.bf16.mxu0 %v4386_v18 }
 0x546   :  { %3861 = vmatprep.subr.bf16.mxu1 %v4387_v20 }
 0x548   :  { %3222 = vmatpush1.bf16.msra.mxu0 %v4384_v22 }
 0x549   :  { %3862 = vmatpush3.bf16.msra.mxu1 %v4388_v24  ;;  %3223 = vmatprep.subr.bf16.mxu0 %v4391_v25 }
 0x54a   :  { %3863 = vmatprep.subr.bf16.mxu1 %v4392_v0 }
 0x54c   :  { %3224 = vmatpush1.bf16.msra.mxu0 %v4389_v27 }
 0x54d   :  { %3864 = vmatpush3.bf16.msra.mxu1 %v4393_v28  ;;  %3225 = vmatprep.subr.bf16.mxu0 %v4396_v29 }
 0x54e   :  { %3865 = vmatprep.subr.bf16.mxu1 %v4397_v30 }
 0x550   :  { %3226 = vmatpush1.bf16.msra.mxu0 %v4394_v6 }
 0x551   :  { %3866 = vmatpush3.bf16.msra.mxu1 %v4398_v31  ;;  %3227 = vmatprep.subr.bf16.mxu0 %v4401_v32 }
 0x552   :  { %3867 = vmatprep.subr.bf16.mxu1 %v4402_v33 }
 0x554   :  { %3228 = vmatpush1.bf16.msra.mxu0 %v4399_v34 }
 0x555   :  { %3868 = vmatpush3.bf16.msra.mxu1 %v4403_v35  ;;  %3229 = vmatprep.subr.bf16.mxu0 %v4406_v36  ;;  %v1874_v35 = vsub.s32 6, %v4858_v46 }
 0x556   :  { %3869 = vmatprep.subr.bf16.mxu1 %v4407_v37 }
 0x557   :  { %v1875_v36 = vrot.slane %v1846_v12, %v1874_v35 }
 0x558   :  { %3230 = vmatpush1.bf16.msra.mxu0 %v4404_v38 }
 0x559   :  { %3870 = vmatpush3.bf16.msra.mxu1 %v4408_v39  ;;  %3240 = vmatprep.subr.bf16.mxu0 %v4411_v40 }
 0x55b   :  { %3232 = vmatmul.mubr.bf16.vlgmr.msra.gmra.mrb[20].mxu0 %v5316_v23  ;;  %v4420_v23 = vld [vmem:[%s5854_s14 + $0x43c] ss:$28 sps:$4 sm:$0xff]  }
 0x55c   :  { %3354 = vmatmul.mubr.bf16.vlgmr.msra.gmra.mrb[32].mxu1 %v5518_v2  ;;  %3241 = vmatpush1.bf16.msra.mxu0 %v4409_v41 }
 0x55d   :  { %3272 = vmatprep.mubr.bf16.mxu0 %v5326_v26  ;;  %3242 = vmatprep.subr.bf16.mxu0 %v4414_v42  ;;  %v4418_v26 = vld [vmem:[%s5854_s14 + $0x438] ss:$28 sps:$4 sm:$0xff]  }
 0x560   :  { %3243 = vmatpush1.bf16.msra.mxu0 %v4412_v19 }
 0x561   :  { %3244 = vmatprep.subr.bf16.mxu0 %v4417_v43 }
 0x564   :  { %3245 = vmatpush1.bf16.msra.mxu0 %v4415_v44  ;;  %v1866_v44 = vsub.s32 4, %v4858_v46 }
 0x565   :  { %3246 = vmatprep.subr.bf16.mxu0 %v4420_v23  ;;  %v1870_v23 = vsub.s32 5, %v4858_v46 }
 0x568   :  { %3247 = vmatpush1.bf16.msra.mxu0 %v4418_v26  ;;  %v1867_v26 = vrot.slane %v1846_v12, %v1866_v44 }
 0x569   :  { %3248 = vmatprep.subr.bf16.mxu0 %v4423_v45  ;;  %v1871_v45 = vrot.slane %v1846_v12, %v1870_v23 }
 0x56c   :  { %3249 = vmatpush1.bf16.msra.mxu0 %v4421_v48 }
 0x56d   :  { %3250 = vmatprep.subr.bf16.mxu0 %v4426_v51 }
 0x570   :  { %3251 = vmatpush1.bf16.msra.mxu0 %v4424_v52 }
 0x571   :  { %3252 = vmatprep.subr.bf16.mxu0 %v4429_v53 }
 0x574   :  { %3253 = vmatpush1.bf16.msra.mxu0 %v4427_v54 }
 0x575   :  { %3254 = vmatprep.subr.bf16.mxu0 %v4432_v55 }
 0x578   :  { %3255 = vmatpush1.bf16.msra.mxu0 %v4430_v56 }
 0x579   :  { %3256 = vmatprep.subr.bf16.mxu0 %v4435_v57 }
 0x57c   :  { %3257 = vmatpush1.bf16.msra.mxu0 %v4433_v58 }
 0x57d   :  { %3258 = vmatprep.subr.bf16.mxu0 %v4438_v59 }
 0x580   :  { %3259 = vmatpush1.bf16.msra.mxu0 %v4436_v60 }
 0x581   :  { %3260 = vmatprep.subr.bf16.mxu0 %v4441_v61 }
 0x584   :  { %3261 = vmatpush1.bf16.msra.mxu0 %v4439_v62 }
 0x585   :  { %3262 = vmatprep.subr.bf16.mxu0 %v4444_v63 }
 0x588   :  { %3263 = vmatpush1.bf16.msra.mxu0 %v4442_v1 }
 0x589   :  { %3264 = vmatprep.subr.bf16.mxu0 %v4447_v3 }
 0x58c   :  { %3265 = vmatpush1.bf16.msra.mxu0 %v4445_v4 }
 0x58d   :  { %3266 = vmatprep.subr.bf16.mxu0 %v4450_v5 }
 0x590   :  { %3267 = vmatpush1.bf16.msra.mxu0 %v4448_v7 }
 0x591   :  { %3268 = vmatprep.subr.bf16.mxu0 %v4453_v8 }
 0x594   :  { %3269 = vmatpush1.bf16.msra.mxu0 %v4451_v9 }
 0x595   :  { %3270 = vmatprep.subr.bf16.mxu0 %v4456_v10 }
 0x598   :  { %3271 = vmatpush1.bf16.msra.mxu0 %v4454_v11 }
 0x59b   :  { %3273 = vmatmul.mubr.bf16.vlgmr.msra.gmra.mrb[20].mxu0 %v5518_v2 }
 0x5ee   :  { %v3110_v17 = vpop.f32.mrb[16].mxu0  ;;  %v3192_v18 = vpop.f32.mrb[24].mxu1 }
 0x5ef   :  { %v3917_v20 = vadd.f32 %v3110_v17, %v1851_v13  ;;  %v3919_v22 = vadd.f32 %v3192_v18, %v1859_v14  ;;  %v3112_v24 = vpop.f32.mrb[17].mxu0  ;;  %v3194_v25 = vpop.f32.mrb[25].mxu1 }
 0x5f0   :  { %v3918_v0 = vadd.f32 %v3112_v24, %v1855_v15  ;;  %v3920_v2 = vadd.f32 %v3194_v25, %v1863_v16  ;;  %v3114_v27 = vpop.f32.mrb[18].mxu0  ;;  %v3196_v28 = vpop.f32.mrb[26].mxu1 }
 0x5f1   :  { %v3361_v29 = vmax.f32 %v3917_v20, 0.0  ;;  %v3363_v30 = vmax.f32 %v3919_v22, 0.0  ;;  %v3115_v6 = vpop.f32.mrb[19].mxu0  ;;  %v3197_v47 = vpop.f32.mrb[27].mxu1 }
 0x5f2   :  { %v3362_v31 = vmax.f32 %v3918_v0, 0.0  ;;  %v3364_v21 = vmax.f32 %v3920_v2, 0.0 }
 0x5f3   :  { %3368 = vst [vmem:[%s5867_s15] sm:$0xff] %v3361_v29  ;;  %3370 = vst [vmem:[%s5867_s15 + $0x10] sm:$0xff] %v3363_v30 }
 0x5f4   :  { %3369 = vst [vmem:[%s5867_s15 + $0x8] sm:$0xff] %v3362_v31  ;;  %3371 = vst [vmem:[%s5867_s15 + $0x18] sm:$0xff] %v3364_v21 }
 0x60f   :  { %v3849_v49 = vpop.f32.mrb[28].mxu1 }
 0x610   :  { %v3850_v50 = vpop.f32.mrb[29].mxu1 }
 0x611   :  { %v3851_v32 = vadd.f32 %v3850_v50, %v3849_v49  ;;  %v3852_v33 = vpop.f32.mrb[30].mxu1 }
 0x612   :  { %v3853_v34 = vpop.f32.mrb[31].mxu1 }
 0x613   :  { %v3316_v39 = vadd.f32 %v3851_v32, %v1875_v36 }
 0x62f   :  { %v3871_v37 = vpop.f32.mrb[32].mxu1 }
 0x630   :  { %v3872_v38 = vpop.f32.mrb[33].mxu1 }
 0x631   :  { %v3873_v40 = vadd.f32 %v3872_v38, %v3871_v37  ;;  %v3874_v41 = vpop.f32.mrb[34].mxu1 }
 0x632   :  { %v3875_v42 = vpop.f32.mrb[35].mxu1 }
 0x633   :  { %v3356_v19 = vadd.f32 %v3873_v40, %v3316_v39 }
 0x635   :  { %v3367_v43 = vmax.f32 %v3356_v19, 0.0 }
 0x637   :  { %3374 = vst [vmem:[%s5867_s15 + $0x30] sm:$0xff] %v3367_v43 }
 0x66e   :  { %v3274_v48 = vpop.f32.mrb[20].mxu0 }
 0x66f   :  { %v3921_v51 = vadd.f32 %v3274_v48, %v1867_v26  ;;  %v3276_v52 = vpop.f32.mrb[21].mxu0 }
 0x670   :  { %v3922_v53 = vadd.f32 %v3276_v52, %v1871_v45  ;;  %v3278_v54 = vpop.f32.mrb[22].mxu0 }
 0x671   :  { %v3365_v55 = vmax.f32 %v3921_v51, 0.0  ;;  %v3279_v56 = vpop.f32.mrb[23].mxu0 }
 0x672   :  { %v3366_v57 = vmax.f32 %v3922_v53, 0.0 }
 0x673   :  { %3372 = vst [vmem:[%s5867_s15 + $0x20] sm:$0xff] %v3365_v55 }
 0x674   :  { %3373 = vst [vmem:[%s5867_s15 + $0x28] sm:$0xff] %v3366_v57 }

</bundles_post_ra>
